<compile_context>
chip_gen: v7x
topology: tpu7x:2x2x1
jax: 0.10.0
libtpu: 0.0.40
codegen_flags: <defaults>
</compile_context>

<pallas_src>
import jax
import jax.numpy as jnp
from jax import lax
from jax.experimental import pallas as pl
from jax.experimental.pallas import tpu as pltpu


# ---------------------------------------------------------------------------
# Fused ConvBlock2d kernel (all DoubleConvs + SE in one pallas_call)
# ---------------------------------------------------------------------------

def _make_conv_block_kernel(se_flags, Bt, H, W):
    """se_flags: tuple(bool) per DoubleConv layer. Bt = batch elems per block."""
    del W  # folded into the matrix shapes
    f32 = jnp.float32
    bf16 = jnp.bfloat16
    M = Bt * H

    def build_lhs(x):
        """(M, W*C) f32 -> (M, 3*W*C) bf16 im2row over the 3 height taps.

        Column block 0 holds row h-1, block 1 row h, block 2 row h+1; rows
        outside an element's [0, H) range are zeroed (SAME padding), which
        also keeps batch elements from leaking into each other across the
        roll wrap-around.
        """
        h_idx = jax.lax.broadcasted_iota(jnp.int32, x.shape, 0) % H
        up = jnp.where(h_idx != 0, pltpu.roll(x, shift=1, axis=0), 0.0)       # row h-1
        dn = jnp.where(h_idx != H - 1, pltpu.roll(x, shift=M - 1, axis=0), 0.0)  # row h+1
        return jnp.concatenate([up, x, dn], axis=1).astype(bf16)

    def conv_bn_relu(x, w_ref, sb_ref):
        # One MXU matmul per conv (K = 3*W*Cin); BN scale/bias + ReLU in f32.
        y = jnp.dot(build_lhs(x), w_ref[...], preferred_element_type=f32)
        return jnp.maximum(y * sb_ref[0:1, :] + sb_ref[1:2, :], 0.0)

    def kernel(*refs):
        x_ref = refs[0]
        o_ref = refs[-1]
        x = x_ref[...].astype(f32)                       # (M, W*Cin)
        idx = 1
        for se in se_flags:
            w1, sb1, w2, sb2 = refs[idx:idx + 4]
            idx += 4
            if se:
                se_w1, se_w2, rmat, emat = refs[idx:idx + 4]
                idx += 4
            x = conv_bn_relu(x, w1, sb1)                 # (M, W*Cout)
            x = conv_bn_relu(x, w2, sb2)                 # (M, W*Cout)
            if se:
                # Per-element spatial mean: column-sum per element, then fold
                # the W dimension (and 1/(H*W)) with the tiny rmat matmul.
                colsum = jnp.concatenate(
                    [jnp.sum(x[n * H:(n + 1) * H, :], axis=0, keepdims=True)
                     for n in range(Bt)], axis=0)                          # (Bt, W*Cout)
                pooled = jnp.dot(colsum, rmat[...],
                                 preferred_element_type=f32)               # (Bt, Cout)
                hid = jnp.maximum(
                    jnp.dot(pooled, se_w1[...], preferred_element_type=f32), 0.0)
                z = jnp.dot(hid, se_w2[...], preferred_element_type=f32)
                gate = 1.0 / (1.0 + jnp.exp(-z))                           # (Bt, Cout)
                gflat = jnp.dot(gate, emat[...],
                                preferred_element_type=f32)                # (Bt, W*Cout)
                x = jnp.concatenate(
                    [x[n * H:(n + 1) * H, :] * gflat[n:n + 1, :]
                     for n in range(Bt)], axis=0)
        o_ref[...] = x.astype(o_ref.dtype)

    return kernel


def conv_block2d_forward(x_nchw, params, *, batch_tile=None):
    """Fused Pallas forward. Input/output NCHW (PyTorch convention)."""
    N, Cin, H, W = x_nchw.shape
    Bt = N if batch_tile is None else batch_tile
    assert N % Bt == 0
    Cout = params[-1]["cout"]

    # NCHW -> NHWC -> lane-flattened (N*H, W*C): M = N*H, lanes = W*C.
    x = jnp.transpose(x_nchw, (0, 2, 3, 1)).reshape(N * H, W * Cin)

    in_specs = [pl.BlockSpec((Bt * H, W * Cin), lambda i: (i, 0))]
    args = [x]
    se_flags = []
    for layer in params:
        se = layer["se_w1"] is not None
        se_flags.append(se)
        names = ("w1", "sb1", "w2", "sb2")
        if se:
            names = names + ("se_w1", "se_w2", "rmat", "emat")
        for name in names:
            a = layer[name]
            in_specs.append(pl.BlockSpec(a.shape, lambda i: (0, 0)))
            args.append(a)

    out = pl.pallas_call(
        _make_conv_block_kernel(tuple(se_flags), Bt, H, W),
        out_shape=jax.ShapeDtypeStruct((N * H, W * Cout), jnp.float32),
        grid=(N // Bt,),
        in_specs=in_specs,
        out_specs=pl.BlockSpec((Bt * H, W * Cout), lambda i: (i, 0)),
        compiler_params=pltpu.CompilerParams(
            dimension_semantics=("parallel",),
            vmem_limit_bytes=48 * 1024 * 1024),   # under v7x's 64 MiB ceiling
    )(*args)

    return jnp.transpose(out.reshape(N, H, W, Cout), (0, 3, 1, 2))


# ---------------------------------------------------------------------------
# Parameter preparation (K-folded banded weights, tiled scale/bias, SE mats)
# ---------------------------------------------------------------------------

def _kfolded_weights(w, Wd):
    """(3,3,Cin,Cout) HWIO -> (3*Wd*Cin, Wd*Cout).

    Row block dh stacks the banded matrix for height tap dh:
      B[dh][wi*Cin + ci, wo*Cout + co] = w[dh, dw, ci, co] with wi = wo+dw-1;
    out-of-range width taps are dropped (SAME zero padding along W folded in).
    """
    blocks = []
    for dh in range(3):
        b = None
        for dw in range(3):
            shift = jnp.eye(Wd, k=1 - dw, dtype=jnp.float32)   # S[wi, wo]
            blk = jnp.kron(shift, w[dh, dw])
            b = blk if b is None else b + blk
        blocks.append(b)
    return jnp.concatenate(blocks, axis=0)


def init_conv_block2d_params(key, in_channels, out_channels, conv_times, se,
                             H, W, reduction=2, eps=1e-5):
    params = []
    cin = in_channels
    for _ in range(conv_times):
        layer = {"cin": cin, "cout": out_channels, "raw_convs": []}
        for i in range(2):
            c_in = cin if i == 0 else out_channels
            key, kw, kb, kg, kbeta, km, kv = jax.random.split(key, 7)
            w = 0.1 * jax.random.normal(kw, (3, 3, c_in, out_channels), jnp.float32)
            b = 0.1 * jax.random.normal(kb, (out_channels,), jnp.float32)
            gamma = 1.0 + 0.1 * jax.random.normal(kg, (out_channels,), jnp.float32)
            beta = 0.1 * jax.random.normal(kbeta, (out_channels,), jnp.float32)
            rmean = 0.1 * jax.random.normal(km, (out_channels,), jnp.float32)
            rvar = jax.random.uniform(kv, (out_channels,), jnp.float32, 0.5, 1.5)
            # Fold eval-mode BN (and conv bias) into per-channel scale/bias.
            scale = gamma / jnp.sqrt(rvar + eps)
            bias = (b - rmean) * scale + beta
            # Reference uses the bf16-quantized weights so the check is tight.
            w_q = w.astype(jnp.bfloat16).astype(jnp.float32)
            layer["raw_convs"].append((w_q, scale, bias))
            tag = "1" if i == 0 else "2"
            layer["w" + tag] = _kfolded_weights(w, W).astype(jnp.bfloat16)
            layer["sb" + tag] = jnp.stack(
                [jnp.tile(scale, W), jnp.tile(bias, W)], axis=0)
        if se:
            cr = max(out_channels // reduction, 1)
            key, k1, k2 = jax.random.split(key, 3)
            layer["se_w1"] = 0.2 * jax.random.normal(k1, (out_channels, cr), jnp.float32)
            layer["se_w2"] = 0.2 * jax.random.normal(k2, (cr, out_channels), jnp.float32)
            eye_c = jnp.eye(out_channels, dtype=jnp.float32)
            layer["rmat"] = jnp.kron(jnp.ones((W, 1), jnp.float32), eye_c) / (H * W)
            layer["emat"] = jnp.kron(jnp.ones((1, W), jnp.float32), eye_c)
        else:
            layer["se_w1"] = None
            layer["se_w2"] = None
        params.append(layer)
        cin = out_channels
    return params


# ---------------------------------------------------------------------------
# Pure-JAX reference (lax.conv) for correctness checking
# ---------------------------------------------------------------------------

def conv_block2d_reference(x_nchw, params):
    x = x_nchw
    for layer in params:
        for (w_q, scale, bias) in layer["raw_convs"]:
            # Quantize activations at the same points the kernel does (bf16
            # MXU operands, f32 accumulation).
            xq = x.astype(jnp.bfloat16).astype(jnp.float32)
            y = lax.conv_general_dilated(
                xq, jnp.transpose(w_q, (3, 2, 0, 1)),            # HWIO -> OIHW
                window_strides=(1, 1), padding="SAME",
                dimension_numbers=("NCHW", "OIHW", "NCHW"),
                precision=lax.Precision.HIGHEST)
            y = y * scale.reshape(1, -1, 1, 1) + bias.reshape(1, -1, 1, 1)
            x = jnp.maximum(y, 0.0)
        if layer["se_w1"] is not None:
            pooled = jnp.mean(x, axis=(2, 3))                    # (N, C)
            h = jnp.maximum(pooled @ layer["se_w1"], 0.0)
            gate = jax.nn.sigmoid(h @ layer["se_w2"])
            x = x * gate[:, :, None, None]
    return x


if __name__ == "__main__":
    key = jax.random.PRNGKey(0)
    key, kx, kp, kp2 = jax.random.split(key, 4)

    # Small shapes: batch=2, in_channels=4, out_channels=8, 16x16 spatial.
    N, Cin, H, W = 2, 4, 16, 16
    out_channels, conv_times, se = 8, 2, True

    x = jax.random.normal(kx, (N, Cin, H, W), jnp.float32)

    # Main config: conv_times=2, SE enabled (NetCombineClsSeg defaults).
    params = init_conv_block2d_params(kp, Cin, out_channels, conv_times, se, H, W)
    out = jax.block_until_ready(conv_block2d_forward(x, params))
    ref = conv_block2d_reference(x, params)
    assert out.shape == (N, out_channels, H, W)
    err = float(jnp.max(jnp.abs(out - ref)))
    assert err < 2e-3, err

    # Also exercise the se=False path once.
    params_nose = init_conv_block2d_params(kp2, Cin, out_channels, 1, False, H, W)
    out2 = jax.block_until_ready(conv_block2d_forward(x, params_nose))
    ref2 = conv_block2d_reference(x, params_nose)
    err2 = float(jnp.max(jnp.abs(out2 - ref2)))
    assert err2 < 2e-3, err2

    print("KERNEL_OK")
</pallas_src>

<mosaic_0001>
module attributes {stable_mosaic.version = 11 : i64} {
  func.func @kernel(%arg0: i32, %arg1: memref<32x64xf32, #tpu.memory_space<vmem>>, %arg2: memref<192x128xbf16, #tpu.memory_space<vmem>>, %arg3: memref<2x128xf32, #tpu.memory_space<vmem>>, %arg4: memref<384x128xbf16, #tpu.memory_space<vmem>>, %arg5: memref<2x128xf32, #tpu.memory_space<vmem>>, %arg6: memref<8x4xf32, #tpu.memory_space<vmem>>, %arg7: memref<4x8xf32, #tpu.memory_space<vmem>>, %arg8: memref<128x8xf32, #tpu.memory_space<vmem>>, %arg9: memref<8x128xf32, #tpu.memory_space<vmem>>, %arg10: memref<384x128xbf16, #tpu.memory_space<vmem>>, %arg11: memref<2x128xf32, #tpu.memory_space<vmem>>, %arg12: memref<384x128xbf16, #tpu.memory_space<vmem>>, %arg13: memref<2x128xf32, #tpu.memory_space<vmem>>, %arg14: memref<8x4xf32, #tpu.memory_space<vmem>>, %arg15: memref<4x8xf32, #tpu.memory_space<vmem>>, %arg16: memref<128x8xf32, #tpu.memory_space<vmem>>, %arg17: memref<8x128xf32, #tpu.memory_space<vmem>>, %arg18: memref<32x128xf32, #tpu.memory_space<vmem>>) attributes {dimension_semantics = [#tpu.dimension_semantics<parallel>], iteration_bounds = array<i64: 1>, scalar_prefetch = 0 : i64, scratch_operands = 0 : i64, tpu.core_type = #tpu.core_type<tc>, window_params = [{transform_indices = @transform_0, window_bounds = array<i64: 32, 64>}, {pipeline_mode = #tpu.pipeline_mode<synchronous>, transform_indices = @transform_1, window_bounds = array<i64: 192, 128>}, {pipeline_mode = #tpu.pipeline_mode<synchronous>, transform_indices = @transform_2, window_bounds = array<i64: 2, 128>}, {pipeline_mode = #tpu.pipeline_mode<synchronous>, transform_indices = @transform_3, window_bounds = array<i64: 384, 128>}, {pipeline_mode = #tpu.pipeline_mode<synchronous>, transform_indices = @transform_4, window_bounds = array<i64: 2, 128>}, {pipeline_mode = #tpu.pipeline_mode<synchronous>, transform_indices = @transform_5, window_bounds = array<i64: 8, 4>}, {pipeline_mode = #tpu.pipeline_mode<synchronous>, transform_indices = @transform_6, window_bounds = array<i64: 4, 8>}, {pipeline_mode = #tpu.pipeline_mode<synchronous>, transform_indices = @transform_7, window_bounds = array<i64: 128, 8>}, {pipeline_mode = #tpu.pipeline_mode<synchronous>, transform_indices = @transform_8, window_bounds = array<i64: 8, 128>}, {pipeline_mode = #tpu.pipeline_mode<synchronous>, transform_indices = @transform_9, window_bounds = array<i64: 384, 128>}, {pipeline_mode = #tpu.pipeline_mode<synchronous>, transform_indices = @transform_10, window_bounds = array<i64: 2, 128>}, {pipeline_mode = #tpu.pipeline_mode<synchronous>, transform_indices = @transform_11, window_bounds = array<i64: 384, 128>}, {pipeline_mode = #tpu.pipeline_mode<synchronous>, transform_indices = @transform_12, window_bounds = array<i64: 2, 128>}, {pipeline_mode = #tpu.pipeline_mode<synchronous>, transform_indices = @transform_13, window_bounds = array<i64: 8, 4>}, {pipeline_mode = #tpu.pipeline_mode<synchronous>, transform_indices = @transform_14, window_bounds = array<i64: 4, 8>}, {pipeline_mode = #tpu.pipeline_mode<synchronous>, transform_indices = @transform_15, window_bounds = array<i64: 128, 8>}, {pipeline_mode = #tpu.pipeline_mode<synchronous>, transform_indices = @transform_16, window_bounds = array<i64: 8, 128>}, {transform_indices = @transform_17, window_bounds = array<i64: 32, 128>}]} {
    %c0 = arith.constant 0 : index
    %c0_0 = arith.constant 0 : index
    %0 = vector.load %arg1[%c0, %c0_0] : memref<32x64xf32, #tpu.memory_space<vmem>>, vector<32x64xf32>
    %1 = tpu.iota {dimensions = array<i32: 0>} : vector<32x64xi32>
    %c16_i32 = arith.constant 16 : i32
    %c0_i32 = arith.constant 0 : i32
    %2 = arith.cmpi eq, %c16_i32, %c0_i32 : i32
    %c1_i32 = arith.constant 1 : i32
    %3 = arith.select %2, %c1_i32, %c16_i32 : i32
    %4 = vector.broadcast %3 : i32 to vector<32x64xi32>
    %5 = arith.remsi %1, %4 : vector<32x64xi32>
    %c0_i32_1 = arith.constant 0 : i32
    %6 = vector.broadcast %c0_i32_1 : i32 to vector<32x64xi32>
    %7 = arith.cmpi ne, %5, %6 : vector<32x64xi32>
    %c0_i32_2 = arith.constant 0 : i32
    %8 = vector.broadcast %c0_i32_2 : i32 to vector<32x64xi32>
    %9 = arith.cmpi slt, %5, %8 : vector<32x64xi32>
    %c0_i32_3 = arith.constant 0 : i32
    %10 = arith.cmpi slt, %3, %c0_i32_3 : i32
    %11 = vector.broadcast %10 : i1 to vector<32x64xi1>
    %12 = vector.broadcast %11 : vector<32x64xi1> to vector<32x64xi1>
    %13 = arith.xori %9, %12 : vector<32x64xi1>
    %14 = arith.andi %13, %7 : vector<32x64xi1>
    %15 = vector.broadcast %3 : i32 to vector<32x64xi32>
    %16 = arith.addi %5, %15 : vector<32x64xi32>
    %17 = arith.select %14, %16, %5 : vector<32x64xi1>, vector<32x64xi32>
    %c0_i32_4 = arith.constant 0 : i32
    %18 = vector.broadcast %c0_i32_4 : i32 to vector<32x64xi32>
    %19 = arith.cmpi ne, %17, %18 : vector<32x64xi32>
    %c1_i32_5 = arith.constant 1 : i32
    %20 = tpu.dynamic_rotate %0 by %c1_i32_5 dim 0 : vector<32x64xf32>, i32 -> vector<32x64xf32>
    %cst = arith.constant 0.000000e+00 : f32
    %21 = vector.broadcast %cst : f32 to vector<32x64xf32>
    %22 = arith.select %19, %20, %21 : vector<32x64xi1>, vector<32x64xf32>
    %c15_i32 = arith.constant 15 : i32
    %23 = vector.broadcast %c15_i32 : i32 to vector<32x64xi32>
    %24 = arith.cmpi ne, %17, %23 : vector<32x64xi32>
    %c31_i32 = arith.constant 31 : i32
    %25 = tpu.dynamic_rotate %0 by %c31_i32 dim 0 : vector<32x64xf32>, i32 -> vector<32x64xf32>
    %cst_6 = arith.constant 0.000000e+00 : f32
    %26 = vector.broadcast %cst_6 : f32 to vector<32x64xf32>
    %27 = arith.select %24, %25, %26 : vector<32x64xi1>, vector<32x64xf32>
    %28 = tpu.concatenate %22, %0, %27 in 1 : vector<32x64xf32>, vector<32x64xf32>, vector<32x64xf32> -> vector<32x192xf32>
    %29 = arith.truncf %28 : vector<32x192xf32> to vector<32x192xbf16>
    %c0_7 = arith.constant 0 : index
    %c0_8 = arith.constant 0 : index
    %30 = vector.load %arg2[%c0_7, %c0_8] : memref<192x128xbf16, #tpu.memory_space<vmem>>, vector<192x128xbf16>
    %cst_9 = arith.constant dense<0.000000e+00> : vector<32x128xf32>
    %31 = tpu.matmul %29, %30, %cst_9 {dimension_numbers = #tpu.dot_dimension_numbers<[1], [0], [0], [1], [0, 0, 1, 1], [], []>} : vector<32x192xbf16>, vector<192x128xbf16>, vector<32x128xf32> -> vector<32x128xf32>
    %c0_10 = arith.constant 0 : index
    %c0_11 = arith.constant 0 : index
    %32 = vector.load %arg3[%c0_10, %c0_11] : memref<2x128xf32, #tpu.memory_space<vmem>>, vector<1x128xf32>
    %33 = vector.broadcast %32 : vector<1x128xf32> to vector<32x128xf32>
    %34 = arith.mulf %31, %33 : vector<32x128xf32>
    %c1 = arith.constant 1 : index
    %c0_12 = arith.constant 0 : index
    %35 = vector.load %arg3[%c1, %c0_12] : memref<2x128xf32, #tpu.memory_space<vmem>>, vector<1x128xf32>
    %36 = vector.broadcast %35 : vector<1x128xf32> to vector<32x128xf32>
    %37 = arith.addf %34, %36 : vector<32x128xf32>
    %cst_13 = arith.constant 0.000000e+00 : f32
    %38 = vector.broadcast %cst_13 : f32 to vector<32x128xf32>
    %39 = arith.maximumf %37, %38 : vector<32x128xf32>
    %40 = tpu.iota {dimensions = array<i32: 0>} : vector<32x128xi32>
    %c16_i32_14 = arith.constant 16 : i32
    %c0_i32_15 = arith.constant 0 : i32
    %41 = arith.cmpi eq, %c16_i32_14, %c0_i32_15 : i32
    %c1_i32_16 = arith.constant 1 : i32
    %42 = arith.select %41, %c1_i32_16, %c16_i32_14 : i32
    %43 = vector.broadcast %42 : i32 to vector<32x128xi32>
    %44 = arith.remsi %40, %43 : vector<32x128xi32>
    %c0_i32_17 = arith.constant 0 : i32
    %45 = vector.broadcast %c0_i32_17 : i32 to vector<32x128xi32>
    %46 = arith.cmpi ne, %44, %45 : vector<32x128xi32>
    %c0_i32_18 = arith.constant 0 : i32
    %47 = vector.broadcast %c0_i32_18 : i32 to vector<32x128xi32>
    %48 = arith.cmpi slt, %44, %47 : vector<32x128xi32>
    %c0_i32_19 = arith.constant 0 : i32
    %49 = arith.cmpi slt, %42, %c0_i32_19 : i32
    %50 = vector.broadcast %49 : i1 to vector<32x128xi1>
    %51 = vector.broadcast %50 : vector<32x128xi1> to vector<32x128xi1>
    %52 = arith.xori %48, %51 : vector<32x128xi1>
    %53 = arith.andi %52, %46 : vector<32x128xi1>
    %54 = vector.broadcast %42 : i32 to vector<32x128xi32>
    %55 = arith.addi %44, %54 : vector<32x128xi32>
    %56 = arith.select %53, %55, %44 : vector<32x128xi1>, vector<32x128xi32>
    %c0_i32_20 = arith.constant 0 : i32
    %57 = vector.broadcast %c0_i32_20 : i32 to vector<32x128xi32>
    %58 = arith.cmpi ne, %56, %57 : vector<32x128xi32>
    %c1_i32_21 = arith.constant 1 : i32
    %59 = tpu.dynamic_rotate %39 by %c1_i32_21 dim 0 : vector<32x128xf32>, i32 -> vector<32x128xf32>
    %cst_22 = arith.constant 0.000000e+00 : f32
    %60 = vector.broadcast %cst_22 : f32 to vector<32x128xf32>
    %61 = arith.select %58, %59, %60 : vector<32x128xi1>, vector<32x128xf32>
    %c15_i32_23 = arith.constant 15 : i32
    %62 = vector.broadcast %c15_i32_23 : i32 to vector<32x128xi32>
    %63 = arith.cmpi ne, %56, %62 : vector<32x128xi32>
    %c31_i32_24 = arith.constant 31 : i32
    %64 = tpu.dynamic_rotate %39 by %c31_i32_24 dim 0 : vector<32x128xf32>, i32 -> vector<32x128xf32>
    %cst_25 = arith.constant 0.000000e+00 : f32
    %65 = vector.broadcast %cst_25 : f32 to vector<32x128xf32>
    %66 = arith.select %63, %64, %65 : vector<32x128xi1>, vector<32x128xf32>
    %67 = tpu.concatenate %61, %39, %66 in 1 : vector<32x128xf32>, vector<32x128xf32>, vector<32x128xf32> -> vector<32x384xf32>
    %68 = arith.truncf %67 : vector<32x384xf32> to vector<32x384xbf16>
    %c0_26 = arith.constant 0 : index
    %c0_27 = arith.constant 0 : index
    %69 = vector.load %arg4[%c0_26, %c0_27] : memref<384x128xbf16, #tpu.memory_space<vmem>>, vector<384x128xbf16>
    %cst_28 = arith.constant dense<0.000000e+00> : vector<32x128xf32>
    %70 = tpu.matmul %68, %69, %cst_28 {dimension_numbers = #tpu.dot_dimension_numbers<[1], [0], [0], [1], [0, 0, 1, 1], [], []>} : vector<32x384xbf16>, vector<384x128xbf16>, vector<32x128xf32> -> vector<32x128xf32>
    %c0_29 = arith.constant 0 : index
    %c0_30 = arith.constant 0 : index
    %71 = vector.load %arg5[%c0_29, %c0_30] : memref<2x128xf32, #tpu.memory_space<vmem>>, vector<1x128xf32>
    %72 = vector.broadcast %71 : vector<1x128xf32> to vector<32x128xf32>
    %73 = arith.mulf %70, %72 : vector<32x128xf32>
    %c1_31 = arith.constant 1 : index
    %c0_32 = arith.constant 0 : index
    %74 = vector.load %arg5[%c1_31, %c0_32] : memref<2x128xf32, #tpu.memory_space<vmem>>, vector<1x128xf32>
    %75 = vector.broadcast %74 : vector<1x128xf32> to vector<32x128xf32>
    %76 = arith.addf %73, %75 : vector<32x128xf32>
    %cst_33 = arith.constant 0.000000e+00 : f32
    %77 = vector.broadcast %cst_33 : f32 to vector<32x128xf32>
    %78 = arith.maximumf %76, %77 : vector<32x128xf32>
    %79 = vector.extract_strided_slice %78 {offsets = [0, 0], sizes = [16, 128], strides = [1, 1]} : vector<32x128xf32> to vector<16x128xf32>
    %cst_34 = arith.constant dense<0.000000e+00> : vector<128xf32>
    %80 = vector.multi_reduction <add>, %79, %cst_34 [0] : vector<16x128xf32> to vector<128xf32>
    %81 = vector.shape_cast %80 : vector<128xf32> to vector<1x128xf32>
    %82 = vector.extract_strided_slice %78 {offsets = [16, 0], sizes = [16, 128], strides = [1, 1]} : vector<32x128xf32> to vector<16x128xf32>
    %cst_35 = arith.constant dense<0.000000e+00> : vector<128xf32>
    %83 = vector.multi_reduction <add>, %82, %cst_35 [0] : vector<16x128xf32> to vector<128xf32>
    %84 = vector.shape_cast %83 : vector<128xf32> to vector<1x128xf32>
    %85 = tpu.concatenate %81, %84 in 0 : vector<1x128xf32>, vector<1x128xf32> -> vector<2x128xf32>
    %c0_36 = arith.constant 0 : index
    %c0_37 = arith.constant 0 : index
    %86 = vector.load %arg8[%c0_36, %c0_37] : memref<128x8xf32, #tpu.memory_space<vmem>>, vector<128x8xf32>
    %cst_38 = arith.constant dense<0.000000e+00> : vector<2x8xf32>
    %87 = tpu.matmul %85, %86, %cst_38 {dimension_numbers = #tpu.dot_dimension_numbers<[1], [0], [0], [1], [0, 0, 1, 1], [], []>} : vector<2x128xf32>, vector<128x8xf32>, vector<2x8xf32> -> vector<2x8xf32>
    %c0_39 = arith.constant 0 : index
    %c0_40 = arith.constant 0 : index
    %88 = vector.load %arg6[%c0_39, %c0_40] : memref<8x4xf32, #tpu.memory_space<vmem>>, vector<8x4xf32>
    %cst_41 = arith.constant dense<0.000000e+00> : vector<2x4xf32>
    %89 = tpu.matmul %87, %88, %cst_41 {dimension_numbers = #tpu.dot_dimension_numbers<[1], [0], [0], [1], [0, 0, 1, 1], [], []>} : vector<2x8xf32>, vector<8x4xf32>, vector<2x4xf32> -> vector<2x4xf32>
    %cst_42 = arith.constant 0.000000e+00 : f32
    %90 = vector.broadcast %cst_42 : f32 to vector<2x4xf32>
    %91 = arith.maximumf %89, %90 : vector<2x4xf32>
    %c0_43 = arith.constant 0 : index
    %c0_44 = arith.constant 0 : index
    %92 = vector.load %arg7[%c0_43, %c0_44] : memref<4x8xf32, #tpu.memory_space<vmem>>, vector<4x8xf32>
    %cst_45 = arith.constant dense<0.000000e+00> : vector<2x8xf32>
    %93 = tpu.matmul %91, %92, %cst_45 {dimension_numbers = #tpu.dot_dimension_numbers<[1], [0], [0], [1], [0, 0, 1, 1], [], []>} : vector<2x4xf32>, vector<4x8xf32>, vector<2x8xf32> -> vector<2x8xf32>
    %cst_46 = arith.constant 0.000000e+00 : f32
    %94 = vector.broadcast %cst_46 : f32 to vector<2x8xf32>
    %95 = arith.subf %94, %93 : vector<2x8xf32>
    %96 = math.exp %95 : vector<2x8xf32>
    %cst_47 = arith.constant 1.000000e+00 : f32
    %97 = vector.broadcast %cst_47 : f32 to vector<2x8xf32>
    %98 = arith.addf %97, %96 : vector<2x8xf32>
    %cst_48 = arith.constant 1.000000e+00 : f32
    %99 = vector.broadcast %cst_48 : f32 to vector<2x8xf32>
    %100 = arith.divf %99, %98 : vector<2x8xf32>
    %c0_49 = arith.constant 0 : index
    %c0_50 = arith.constant 0 : index
    %101 = vector.load %arg9[%c0_49, %c0_50] : memref<8x128xf32, #tpu.memory_space<vmem>>, vector<8x128xf32>
    %cst_51 = arith.constant dense<0.000000e+00> : vector<2x128xf32>
    %102 = tpu.matmul %100, %101, %cst_51 {dimension_numbers = #tpu.dot_dimension_numbers<[1], [0], [0], [1], [0, 0, 1, 1], [], []>} : vector<2x8xf32>, vector<8x128xf32>, vector<2x128xf32> -> vector<2x128xf32>
    %103 = vector.extract_strided_slice %78 {offsets = [0, 0], sizes = [16, 128], strides = [1, 1]} : vector<32x128xf32> to vector<16x128xf32>
    %104 = vector.extract_strided_slice %102 {offsets = [0, 0], sizes = [1, 128], strides = [1, 1]} : vector<2x128xf32> to vector<1x128xf32>
    %105 = vector.broadcast %104 : vector<1x128xf32> to vector<16x128xf32>
    %106 = arith.mulf %103, %105 : vector<16x128xf32>
    %107 = vector.extract_strided_slice %78 {offsets = [16, 0], sizes = [16, 128], strides = [1, 1]} : vector<32x128xf32> to vector<16x128xf32>
    %108 = vector.extract_strided_slice %102 {offsets = [1, 0], sizes = [1, 128], strides = [1, 1]} : vector<2x128xf32> to vector<1x128xf32>
    %109 = vector.broadcast %108 : vector<1x128xf32> to vector<16x128xf32>
    %110 = arith.mulf %107, %109 : vector<16x128xf32>
    %111 = tpu.concatenate %106, %110 in 0 : vector<16x128xf32>, vector<16x128xf32> -> vector<32x128xf32>
    %112 = tpu.iota {dimensions = array<i32: 0>} : vector<32x128xi32>
    %c16_i32_52 = arith.constant 16 : i32
    %c0_i32_53 = arith.constant 0 : i32
    %113 = arith.cmpi eq, %c16_i32_52, %c0_i32_53 : i32
    %c1_i32_54 = arith.constant 1 : i32
    %114 = arith.select %113, %c1_i32_54, %c16_i32_52 : i32
    %115 = vector.broadcast %114 : i32 to vector<32x128xi32>
    %116 = arith.remsi %112, %115 : vector<32x128xi32>
    %c0_i32_55 = arith.constant 0 : i32
    %117 = vector.broadcast %c0_i32_55 : i32 to vector<32x128xi32>
    %118 = arith.cmpi ne, %116, %117 : vector<32x128xi32>
    %c0_i32_56 = arith.constant 0 : i32
    %119 = vector.broadcast %c0_i32_56 : i32 to vector<32x128xi32>
    %120 = arith.cmpi slt, %116, %119 : vector<32x128xi32>
    %c0_i32_57 = arith.constant 0 : i32
    %121 = arith.cmpi slt, %114, %c0_i32_57 : i32
    %122 = vector.broadcast %121 : i1 to vector<32x128xi1>
    %123 = vector.broadcast %122 : vector<32x128xi1> to vector<32x128xi1>
    %124 = arith.xori %120, %123 : vector<32x128xi1>
    %125 = arith.andi %124, %118 : vector<32x128xi1>
    %126 = vector.broadcast %114 : i32 to vector<32x128xi32>
    %127 = arith.addi %116, %126 : vector<32x128xi32>
    %128 = arith.select %125, %127, %116 : vector<32x128xi1>, vector<32x128xi32>
    %c0_i32_58 = arith.constant 0 : i32
    %129 = vector.broadcast %c0_i32_58 : i32 to vector<32x128xi32>
    %130 = arith.cmpi ne, %128, %129 : vector<32x128xi32>
    %c1_i32_59 = arith.constant 1 : i32
    %131 = tpu.dynamic_rotate %111 by %c1_i32_59 dim 0 : vector<32x128xf32>, i32 -> vector<32x128xf32>
    %cst_60 = arith.constant 0.000000e+00 : f32
    %132 = vector.broadcast %cst_60 : f32 to vector<32x128xf32>
    %133 = arith.select %130, %131, %132 : vector<32x128xi1>, vector<32x128xf32>
    %c15_i32_61 = arith.constant 15 : i32
    %134 = vector.broadcast %c15_i32_61 : i32 to vector<32x128xi32>
    %135 = arith.cmpi ne, %128, %134 : vector<32x128xi32>
    %c31_i32_62 = arith.constant 31 : i32
    %136 = tpu.dynamic_rotate %111 by %c31_i32_62 dim 0 : vector<32x128xf32>, i32 -> vector<32x128xf32>
    %cst_63 = arith.constant 0.000000e+00 : f32
    %137 = vector.broadcast %cst_63 : f32 to vector<32x128xf32>
    %138 = arith.select %135, %136, %137 : vector<32x128xi1>, vector<32x128xf32>
    %139 = tpu.concatenate %133, %111, %138 in 1 : vector<32x128xf32>, vector<32x128xf32>, vector<32x128xf32> -> vector<32x384xf32>
    %140 = arith.truncf %139 : vector<32x384xf32> to vector<32x384xbf16>
    %c0_64 = arith.constant 0 : index
    %c0_65 = arith.constant 0 : index
    %141 = vector.load %arg10[%c0_64, %c0_65] : memref<384x128xbf16, #tpu.memory_space<vmem>>, vector<384x128xbf16>
    %cst_66 = arith.constant dense<0.000000e+00> : vector<32x128xf32>
    %142 = tpu.matmul %140, %141, %cst_66 {dimension_numbers = #tpu.dot_dimension_numbers<[1], [0], [0], [1], [0, 0, 1, 1], [], []>} : vector<32x384xbf16>, vector<384x128xbf16>, vector<32x128xf32> -> vector<32x128xf32>
    %c0_67 = arith.constant 0 : index
    %c0_68 = arith.constant 0 : index
    %143 = vector.load %arg11[%c0_67, %c0_68] : memref<2x128xf32, #tpu.memory_space<vmem>>, vector<1x128xf32>
    %144 = vector.broadcast %143 : vector<1x128xf32> to vector<32x128xf32>
    %145 = arith.mulf %142, %144 : vector<32x128xf32>
    %c1_69 = arith.constant 1 : index
    %c0_70 = arith.constant 0 : index
    %146 = vector.load %arg11[%c1_69, %c0_70] : memref<2x128xf32, #tpu.memory_space<vmem>>, vector<1x128xf32>
    %147 = vector.broadcast %146 : vector<1x128xf32> to vector<32x128xf32>
    %148 = arith.addf %145, %147 : vector<32x128xf32>
    %cst_71 = arith.constant 0.000000e+00 : f32
    %149 = vector.broadcast %cst_71 : f32 to vector<32x128xf32>
    %150 = arith.maximumf %148, %149 : vector<32x128xf32>
    %151 = tpu.iota {dimensions = array<i32: 0>} : vector<32x128xi32>
    %c16_i32_72 = arith.constant 16 : i32
    %c0_i32_73 = arith.constant 0 : i32
    %152 = arith.cmpi eq, %c16_i32_72, %c0_i32_73 : i32
    %c1_i32_74 = arith.constant 1 : i32
    %153 = arith.select %152, %c1_i32_74, %c16_i32_72 : i32
    %154 = vector.broadcast %153 : i32 to vector<32x128xi32>
    %155 = arith.remsi %151, %154 : vector<32x128xi32>
    %c0_i32_75 = arith.constant 0 : i32
    %156 = vector.broadcast %c0_i32_75 : i32 to vector<32x128xi32>
    %157 = arith.cmpi ne, %155, %156 : vector<32x128xi32>
    %c0_i32_76 = arith.constant 0 : i32
    %158 = vector.broadcast %c0_i32_76 : i32 to vector<32x128xi32>
    %159 = arith.cmpi slt, %155, %158 : vector<32x128xi32>
    %c0_i32_77 = arith.constant 0 : i32
    %160 = arith.cmpi slt, %153, %c0_i32_77 : i32
    %161 = vector.broadcast %160 : i1 to vector<32x128xi1>
    %162 = vector.broadcast %161 : vector<32x128xi1> to vector<32x128xi1>
    %163 = arith.xori %159, %162 : vector<32x128xi1>
    %164 = arith.andi %163, %157 : vector<32x128xi1>
    %165 = vector.broadcast %153 : i32 to vector<32x128xi32>
    %166 = arith.addi %155, %165 : vector<32x128xi32>
    %167 = arith.select %164, %166, %155 : vector<32x128xi1>, vector<32x128xi32>
    %c0_i32_78 = arith.constant 0 : i32
    %168 = vector.broadcast %c0_i32_78 : i32 to vector<32x128xi32>
    %169 = arith.cmpi ne, %167, %168 : vector<32x128xi32>
    %c1_i32_79 = arith.constant 1 : i32
    %170 = tpu.dynamic_rotate %150 by %c1_i32_79 dim 0 : vector<32x128xf32>, i32 -> vector<32x128xf32>
    %cst_80 = arith.constant 0.000000e+00 : f32
    %171 = vector.broadcast %cst_80 : f32 to vector<32x128xf32>
    %172 = arith.select %169, %170, %171 : vector<32x128xi1>, vector<32x128xf32>
    %c15_i32_81 = arith.constant 15 : i32
    %173 = vector.broadcast %c15_i32_81 : i32 to vector<32x128xi32>
    %174 = arith.cmpi ne, %167, %173 : vector<32x128xi32>
    %c31_i32_82 = arith.constant 31 : i32
    %175 = tpu.dynamic_rotate %150 by %c31_i32_82 dim 0 : vector<32x128xf32>, i32 -> vector<32x128xf32>
    %cst_83 = arith.constant 0.000000e+00 : f32
    %176 = vector.broadcast %cst_83 : f32 to vector<32x128xf32>
    %177 = arith.select %174, %175, %176 : vector<32x128xi1>, vector<32x128xf32>
    %178 = tpu.concatenate %172, %150, %177 in 1 : vector<32x128xf32>, vector<32x128xf32>, vector<32x128xf32> -> vector<32x384xf32>
    %179 = arith.truncf %178 : vector<32x384xf32> to vector<32x384xbf16>
    %c0_84 = arith.constant 0 : index
    %c0_85 = arith.constant 0 : index
    %180 = vector.load %arg12[%c0_84, %c0_85] : memref<384x128xbf16, #tpu.memory_space<vmem>>, vector<384x128xbf16>
    %cst_86 = arith.constant dense<0.000000e+00> : vector<32x128xf32>
    %181 = tpu.matmul %179, %180, %cst_86 {dimension_numbers = #tpu.dot_dimension_numbers<[1], [0], [0], [1], [0, 0, 1, 1], [], []>} : vector<32x384xbf16>, vector<384x128xbf16>, vector<32x128xf32> -> vector<32x128xf32>
    %c0_87 = arith.constant 0 : index
    %c0_88 = arith.constant 0 : index
    %182 = vector.load %arg13[%c0_87, %c0_88] : memref<2x128xf32, #tpu.memory_space<vmem>>, vector<1x128xf32>
    %183 = vector.broadcast %182 : vector<1x128xf32> to vector<32x128xf32>
    %184 = arith.mulf %181, %183 : vector<32x128xf32>
    %c1_89 = arith.constant 1 : index
    %c0_90 = arith.constant 0 : index
    %185 = vector.load %arg13[%c1_89, %c0_90] : memref<2x128xf32, #tpu.memory_space<vmem>>, vector<1x128xf32>
    %186 = vector.broadcast %185 : vector<1x128xf32> to vector<32x128xf32>
    %187 = arith.addf %184, %186 : vector<32x128xf32>
    %cst_91 = arith.constant 0.000000e+00 : f32
    %188 = vector.broadcast %cst_91 : f32 to vector<32x128xf32>
    %189 = arith.maximumf %187, %188 : vector<32x128xf32>
    %190 = vector.extract_strided_slice %189 {offsets = [0, 0], sizes = [16, 128], strides = [1, 1]} : vector<32x128xf32> to vector<16x128xf32>
    %cst_92 = arith.constant dense<0.000000e+00> : vector<128xf32>
    %191 = vector.multi_reduction <add>, %190, %cst_92 [0] : vector<16x128xf32> to vector<128xf32>
    %192 = vector.shape_cast %191 : vector<128xf32> to vector<1x128xf32>
    %193 = vector.extract_strided_slice %189 {offsets = [16, 0], sizes = [16, 128], strides = [1, 1]} : vector<32x128xf32> to vector<16x128xf32>
    %cst_93 = arith.constant dense<0.000000e+00> : vector<128xf32>
    %194 = vector.multi_reduction <add>, %193, %cst_93 [0] : vector<16x128xf32> to vector<128xf32>
    %195 = vector.shape_cast %194 : vector<128xf32> to vector<1x128xf32>
    %196 = tpu.concatenate %192, %195 in 0 : vector<1x128xf32>, vector<1x128xf32> -> vector<2x128xf32>
    %c0_94 = arith.constant 0 : index
    %c0_95 = arith.constant 0 : index
    %197 = vector.load %arg16[%c0_94, %c0_95] : memref<128x8xf32, #tpu.memory_space<vmem>>, vector<128x8xf32>
    %cst_96 = arith.constant dense<0.000000e+00> : vector<2x8xf32>
    %198 = tpu.matmul %196, %197, %cst_96 {dimension_numbers = #tpu.dot_dimension_numbers<[1], [0], [0], [1], [0, 0, 1, 1], [], []>} : vector<2x128xf32>, vector<128x8xf32>, vector<2x8xf32> -> vector<2x8xf32>
    %c0_97 = arith.constant 0 : index
    %c0_98 = arith.constant 0 : index
    %199 = vector.load %arg14[%c0_97, %c0_98] : memref<8x4xf32, #tpu.memory_space<vmem>>, vector<8x4xf32>
    %cst_99 = arith.constant dense<0.000000e+00> : vector<2x4xf32>
    %200 = tpu.matmul %198, %199, %cst_99 {dimension_numbers = #tpu.dot_dimension_numbers<[1], [0], [0], [1], [0, 0, 1, 1], [], []>} : vector<2x8xf32>, vector<8x4xf32>, vector<2x4xf32> -> vector<2x4xf32>
    %cst_100 = arith.constant 0.000000e+00 : f32
    %201 = vector.broadcast %cst_100 : f32 to vector<2x4xf32>
    %202 = arith.maximumf %200, %201 : vector<2x4xf32>
    %c0_101 = arith.constant 0 : index
    %c0_102 = arith.constant 0 : index
    %203 = vector.load %arg15[%c0_101, %c0_102] : memref<4x8xf32, #tpu.memory_space<vmem>>, vector<4x8xf32>
    %cst_103 = arith.constant dense<0.000000e+00> : vector<2x8xf32>
    %204 = tpu.matmul %202, %203, %cst_103 {dimension_numbers = #tpu.dot_dimension_numbers<[1], [0], [0], [1], [0, 0, 1, 1], [], []>} : vector<2x4xf32>, vector<4x8xf32>, vector<2x8xf32> -> vector<2x8xf32>
    %cst_104 = arith.constant 0.000000e+00 : f32
    %205 = vector.broadcast %cst_104 : f32 to vector<2x8xf32>
    %206 = arith.subf %205, %204 : vector<2x8xf32>
    %207 = math.exp %206 : vector<2x8xf32>
    %cst_105 = arith.constant 1.000000e+00 : f32
    %208 = vector.broadcast %cst_105 : f32 to vector<2x8xf32>
    %209 = arith.addf %208, %207 : vector<2x8xf32>
    %cst_106 = arith.constant 1.000000e+00 : f32
    %210 = vector.broadcast %cst_106 : f32 to vector<2x8xf32>
    %211 = arith.divf %210, %209 : vector<2x8xf32>
    %c0_107 = arith.constant 0 : index
    %c0_108 = arith.constant 0 : index
    %212 = vector.load %arg17[%c0_107, %c0_108] : memref<8x128xf32, #tpu.memory_space<vmem>>, vector<8x128xf32>
    %cst_109 = arith.constant dense<0.000000e+00> : vector<2x128xf32>
    %213 = tpu.matmul %211, %212, %cst_109 {dimension_numbers = #tpu.dot_dimension_numbers<[1], [0], [0], [1], [0, 0, 1, 1], [], []>} : vector<2x8xf32>, vector<8x128xf32>, vector<2x128xf32> -> vector<2x128xf32>
    %214 = vector.extract_strided_slice %189 {offsets = [0, 0], sizes = [16, 128], strides = [1, 1]} : vector<32x128xf32> to vector<16x128xf32>
    %215 = vector.extract_strided_slice %213 {offsets = [0, 0], sizes = [1, 128], strides = [1, 1]} : vector<2x128xf32> to vector<1x128xf32>
    %216 = vector.broadcast %215 : vector<1x128xf32> to vector<16x128xf32>
    %217 = arith.mulf %214, %216 : vector<16x128xf32>
    %218 = vector.extract_strided_slice %189 {offsets = [16, 0], sizes = [16, 128], strides = [1, 1]} : vector<32x128xf32> to vector<16x128xf32>
    %219 = vector.extract_strided_slice %213 {offsets = [1, 0], sizes = [1, 128], strides = [1, 1]} : vector<2x128xf32> to vector<1x128xf32>
    %220 = vector.broadcast %219 : vector<1x128xf32> to vector<16x128xf32>
    %221 = arith.mulf %218, %220 : vector<16x128xf32>
    %222 = tpu.concatenate %217, %221 in 0 : vector<16x128xf32>, vector<16x128xf32> -> vector<32x128xf32>
    %c0_110 = arith.constant 0 : index
    %c0_111 = arith.constant 0 : index
    %223 = vector.load %arg18[%c0_110, %c0_111] : memref<32x128xf32, #tpu.memory_space<vmem>>, vector<32x128xf32>
    tpu.vector_store %arg18[%c0_110, %c0_111], %222 {strides = array<i32>} : memref<32x128xf32, #tpu.memory_space<vmem>>, vector<32x128xf32>,
    return
  }
  func.func @transform_0(%arg0: i32) -> (i32, i32) {
    %c0_i32 = arith.constant 0 : i32
    %c0_i32_0 = arith.constant 0 : i32
    return %arg0, %c0_i32 : i32, i32
  }
  func.func @transform_1(%arg0: i32) -> (i32, i32) {
    %c0_i32 = arith.constant 0 : i32
    %c0_i32_0 = arith.constant 0 : i32
    %c0_i32_1 = arith.constant 0 : i32
    return %c0_i32, %c0_i32_0 : i32, i32
  }
  func.func @transform_2(%arg0: i32) -> (i32, i32) {
    %c0_i32 = arith.constant 0 : i32
    %c0_i32_0 = arith.constant 0 : i32
    %c0_i32_1 = arith.constant 0 : i32
    return %c0_i32, %c0_i32_0 : i32, i32
  }
  func.func @transform_3(%arg0: i32) -> (i32, i32) {
    %c0_i32 = arith.constant 0 : i32
    %c0_i32_0 = arith.constant 0 : i32
    %c0_i32_1 = arith.constant 0 : i32
    return %c0_i32, %c0_i32_0 : i32, i32
  }
  func.func @transform_4(%arg0: i32) -> (i32, i32) {
    %c0_i32 = arith.constant 0 : i32
    %c0_i32_0 = arith.constant 0 : i32
    %c0_i32_1 = arith.constant 0 : i32
    return %c0_i32, %c0_i32_0 : i32, i32
  }
  func.func @transform_5(%arg0: i32) -> (i32, i32) {
    %c0_i32 = arith.constant 0 : i32
    %c0_i32_0 = arith.constant 0 : i32
    %c0_i32_1 = arith.constant 0 : i32
    return %c0_i32, %c0_i32_0 : i32, i32
  }
  func.func @transform_6(%arg0: i32) -> (i32, i32) {
    %c0_i32 = arith.constant 0 : i32
    %c0_i32_0 = arith.constant 0 : i32
    %c0_i32_1 = arith.constant 0 : i32
    return %c0_i32, %c0_i32_0 : i32, i32
  }
  func.func @transform_7(%arg0: i32) -> (i32, i32) {
    %c0_i32 = arith.constant 0 : i32
    %c0_i32_0 = arith.constant 0 : i32
    %c0_i32_1 = arith.constant 0 : i32
    return %c0_i32, %c0_i32_0 : i32, i32
  }
  func.func @transform_8(%arg0: i32) -> (i32, i32) {
    %c0_i32 = arith.constant 0 : i32
    %c0_i32_0 = arith.constant 0 : i32
    %c0_i32_1 = arith.constant 0 : i32
    return %c0_i32, %c0_i32_0 : i32, i32
  }
  func.func @transform_9(%arg0: i32) -> (i32, i32) {
    %c0_i32 = arith.constant 0 : i32
    %c0_i32_0 = arith.constant 0 : i32
    %c0_i32_1 = arith.constant 0 : i32
    return %c0_i32, %c0_i32_0 : i32, i32
  }
  func.func @transform_10(%arg0: i32) -> (i32, i32) {
    %c0_i32 = arith.constant 0 : i32
    %c0_i32_0 = arith.constant 0 : i32
    %c0_i32_1 = arith.constant 0 : i32
    return %c0_i32, %c0_i32_0 : i32, i32
  }
  func.func @transform_11(%arg0: i32) -> (i32, i32) {
    %c0_i32 = arith.constant 0 : i32
    %c0_i32_0 = arith.constant 0 : i32
    %c0_i32_1 = arith.constant 0 : i32
    return %c0_i32, %c0_i32_0 : i32, i32
  }
  func.func @transform_12(%arg0: i32) -> (i32, i32) {
    %c0_i32 = arith.constant 0 : i32
    %c0_i32_0 = arith.constant 0 : i32
    %c0_i32_1 = arith.constant 0 : i32
    return %c0_i32, %c0_i32_0 : i32, i32
  }
  func.func @transform_13(%arg0: i32) -> (i32, i32) {
    %c0_i32 = arith.constant 0 : i32
    %c0_i32_0 = arith.constant 0 : i32
    %c0_i32_1 = arith.constant 0 : i32
    return %c0_i32, %c0_i32_0 : i32, i32
  }
  func.func @transform_14(%arg0: i32) -> (i32, i32) {
    %c0_i32 = arith.constant 0 : i32
    %c0_i32_0 = arith.constant 0 : i32
    %c0_i32_1 = arith.constant 0 : i32
    return %c0_i32, %c0_i32_0 : i32, i32
  }
  func.func @transform_15(%arg0: i32) -> (i32, i32) {
    %c0_i32 = arith.constant 0 : i32
    %c0_i32_0 = arith.constant 0 : i32
    %c0_i32_1 = arith.constant 0 : i32
    return %c0_i32, %c0_i32_0 : i32, i32
  }
  func.func @transform_16(%arg0: i32) -> (i32, i32) {
    %c0_i32 = arith.constant 0 : i32
    %c0_i32_0 = arith.constant 0 : i32
    %c0_i32_1 = arith.constant 0 : i32
    return %c0_i32, %c0_i32_0 : i32, i32
  }
  func.func @transform_17(%arg0: i32) -> (i32, i32) {
    %c0_i32 = arith.constant 0 : i32
    %c0_i32_0 = arith.constant 0 : i32
    return %arg0, %c0_i32 : i32, i32
  }
}

</mosaic_0001>

<bundles_post_ra>
// kernel: tpu_custom_call.1
= control target key start
LH: loop header
LB: loop body
LE: loop exit
PB: predicated region body
PF: predicated region fallthrough
CT: control target
= control target key end

     0   :  { %s3622_s0 = inlined_call_operand.hbm [shape: f32[32,64], index: 0, kind: input, shape index: {}]   ;;  %s3623_s1 = inlined_call_operand.vmem [shape: bf16[192,128], index: 1, kind: input, shape index: {}]   ;;  %s3624_s2 = inlined_call_operand.vmem [shape: f32[2,128], index: 2, kind: input, shape index: {}]   ;;  %s3625_s3 = inlined_call_operand.vmem [shape: bf16[384,128], index: 3, kind: input, shape index: {}]   ;;  %s3626_s4 = inlined_call_operand.hbm [shape: f32[2,128], index: 4, kind: input, shape index: {}]   ;;  %s3627_s5 = inlined_call_operand.vmem [shape: f32[8,4], index: 5, kind: input, shape index: {}]   ;;  %s3628_s6 = inlined_call_operand.hbm [shape: f32[4,8], index: 6, kind: input, shape index: {}]   ;;  %s3629_s7 = inlined_call_operand.vmem [shape: f32[128,8], index: 7, kind: input, shape index: {}]   ;;  %s3630_s8 = inlined_call_operand.vmem [shape: f32[8,128], index: 8, kind: input, shape index: {}]   ;;  %s3631_s9 = inlined_call_operand.hbm [shape: bf16[384,128], index: 9, kind: input, shape index: {}]   ;;  %s3632_s10 = inlined_call_operand.vmem [shape: f32[2,128], index: 10, kind: input, shape index: {}]   ;;  %s3633_s11 = inlined_call_operand.hbm [shape: bf16[384,128], index: 11, kind: input, shape index: {}]   ;;  %s3634_s12 = inlined_call_operand.vmem [shape: f32[2,128], index: 12, kind: input, shape index: {}]   ;;  %s3635_s13 = inlined_call_operand.vmem [shape: f32[8,4], index: 13, kind: input, shape index: {}]   ;;  %s3636_s14 = inlined_call_operand.vmem [shape: f32[4,8], index: 14, kind: input, shape index: {}]   ;;  %s3637_s15 = inlined_call_operand.vmem [shape: f32[128,8], index: 15, kind: input, shape index: {}]   ;;  %s3638_s16 = inlined_call_operand.vmem [shape: f32[8,128], index: 16, kind: input, shape index: {}]   ;;  %s3639_s17 = inlined_call_operand.hbm [shape: f32[32,128], index: 17, kind: output, shape index: {}]  }
   0x1   :  { %3645 = sst [smem:[#allocation16_spill]] %s3622_s0 }
   0x2   :  { %3646 = sst [smem:[#allocation17_spill]] %s3623_s1 }
   0x3   :  { %22 = vsyncpa [#allocation3], 0 }
   0x4   :  { %23 = vsyncpa [#allocation6], 0 }
   0x5   :  { %24 = vsyncpa [#allocation9], 0 }
   0x6   :  { %25 = vsyncpa [#allocation4], 0  ;;  %s2917_s24 = smov [#allocation5]   ;;  %s2918_s26 = smov [#allocation8]  }
   0x7   :  { %s50_s25 = sshll.u32 %s2917_s24, 4  ;;  %s75_s27 = sshll.u32 %s2918_s26, 4  ;;  %s51_s25 = int_to_ptr.vmem [resolvable:$true] %s50_s25  ;;  %s3022_s27 = int_to_ptr.vmem [resolvable:$true] %s75_s27 }
   0x8   :  { %s2777_s0 = scalar_lea.hbm %s3626_s4, 32 }
   0x9   :  { %p2778_p0 = scmp.ne.s32.totalorder %s3626_s4, %s2777_s0  ;;  %p2781_p1 = scmp.lt.u32.totalorder %s2777_s0, %s3626_s4 }
   0xb   :  { %p2783_p2 = pnand %p2781_p1, %p2778_p0 }
   0xd   :  { %2786 = shalt.err (!%p2783_p2)
}
   0xe   :  { %s2787_s20 = scalar_lea.vmem %s51_s25, 32  ;;  %p2792_p4 = scmp.lt.s32.totalorder %s51_s25, %s51_s25 }
   0xf   :  { %p2788_p3 = scmp.ne.s32.totalorder %s51_s25, %s2787_s20  ;;  %p2793_p5 = scmp.lt.s32.totalorder %s2787_s20, %s2787_s20 }
  0x11   :  { %p2794_p6 = por %p2793_p5, %p2792_p4 }
  0x13   :  { %p2795_p7 = pnand %p2794_p6, %p2788_p3 }
  0x15   :  { %2798 = shalt.err (!%p2795_p7)
}
  0x16   :  { %53 = dma.hbm_to_vmem [thread:$0]  %s3626_s4, 32, %s51_s25, [#allocation6]  }
  0x17   :  { %s2799_s26 = scalar_lea.hbm %s3631_s9, 3072 }
  0x18   :  { %p2800_p8 = scmp.ne.s32.totalorder %s3631_s9, %s2799_s26  ;;  %p2803_p9 = scmp.lt.u32.totalorder %s2799_s26, %s3631_s9 }
  0x1a   :  { %p2805_p10 = pnand %p2803_p9, %p2800_p8 }
  0x1c   :  { %2808 = shalt.err (!%p2805_p10)
}
  0x1d   :  { %s2809_s18 = scalar_lea.vmem %s3022_s27, 3072  ;;  %p2814_p12 = scmp.lt.s32.totalorder %s3022_s27, %s3022_s27 }
  0x1e   :  { %p2810_p11 = scmp.ne.s32.totalorder %s3022_s27, %s2809_s18  ;;  %p2815_p13 = scmp.lt.s32.totalorder %s2809_s18, %s2809_s18 }
  0x20   :  { %p2816_p0 = por %p2815_p13, %p2814_p12 }
  0x22   :  { %p2817_p1 = pnand %p2816_p0, %p2810_p11 }
  0x24   :  { %2820 = shalt.err (!%p2817_p1)
}
  0x25   :  { %s3642_s4 = smov 64   ;;  %s3644_s25 = smov 4  }
  0x26   :  { %81 = dma.hbm_to_vmem [thread:$0]  %s3631_s9, 3072, %s3022_s27, [#allocation9], %s3642_s4, %s3642_s4, %s3644_s25  }
  0x27   :  { %s2921_s20 = smov [#allocation2]   ;;  %s3647_s24 = sld [smem:[#allocation16_spill]] }
  0x28   :  { %s31_s21 = sshll.u32 %s2921_s20, 4  ;;  %s32_s21 = int_to_ptr.vmem [resolvable:$true] %s31_s21 }
  0x2d   :  { %s2821_s26 = scalar_lea.hbm %s3647_s24, 512 }
  0x2e   :  { %p2822_p2 = scmp.ne.s32.totalorder %s3647_s24, %s2821_s26  ;;  %p2825_p3 = scmp.lt.u32.totalorder %s2821_s26, %s3647_s24 }
  0x30   :  { %p2827_p4 = pnand %p2825_p3, %p2822_p2 }
  0x32   :  { %2830 = shalt.err (!%p2827_p4)
}
  0x33   :  { %s2831_s18 = scalar_lea.vmem %s32_s21, 512  ;;  %p2836_p6 = scmp.lt.s32.totalorder %s32_s21, %s32_s21 }
  0x34   :  { %p2832_p5 = scmp.ne.s32.totalorder %s32_s21, %s2831_s18  ;;  %p2837_p7 = scmp.lt.s32.totalorder %s2831_s18, %s2831_s18 }
  0x36   :  { %p2838_p8 = por %p2837_p7, %p2836_p6 }
  0x38   :  { %p2839_p9 = pnand %p2838_p8, %p2832_p5 }
  0x3a   :  { %2842 = shalt.err (!%p2839_p9)
}
  0x3b   :  { %s2922_s9 = smov 128   ;;  %s2923_s27 = smov 8  }
  0x3c   :  { %37 = dma.hbm_to_vmem [thread:$0]  %s3647_s24, 512, %s32_s21, [#allocation3], %s2922_s9, %s2922_s9, %s2923_s27  }
  0x3d   :  { %s2924_s20 = smov [#allocation7]   ;;  %s2925_s23 = smov [#allocation10]  }
  0x3e   :  { %s62_s22 = sshll.u32 %s2924_s20, 4  ;;  %s89_s26 = sshll.u32 %s2925_s23, 4  ;;  %s63_s22 = int_to_ptr.vmem [resolvable:$true] %s62_s22  ;;  %s90_s26 = int_to_ptr.vmem [resolvable:$true] %s89_s26 }
  0x3f   :  { %s2843_s0 = scalar_lea.hbm %s3628_s6, 64 }
  0x40   :  { %p2844_p10 = scmp.ne.s32.totalorder %s3628_s6, %s2843_s0  ;;  %p2847_p11 = scmp.lt.u32.totalorder %s2843_s0, %s3628_s6 }
  0x42   :  { %p2849_p12 = pnand %p2847_p11, %p2844_p10 }
  0x44   :  { %2852 = shalt.err (!%p2849_p12)
}
  0x45   :  { %s2853_s21 = scalar_lea.vmem %s63_s22, 64  ;;  %p2858_p0 = scmp.lt.s32.totalorder %s63_s22, %s63_s22 }
  0x46   :  { %p2854_p13 = scmp.ne.s32.totalorder %s63_s22, %s2853_s21  ;;  %p2859_p1 = scmp.lt.s32.totalorder %s2853_s21, %s2853_s21 }
  0x48   :  { %p2860_p2 = por %p2859_p1, %p2858_p0 }
  0x4a   :  { %p2861_p3 = pnand %p2860_p2, %p2854_p13 }
  0x4c   :  { %2864 = shalt.err (!%p2861_p3)
}
  0x4d   :  { %65 = dma.hbm_to_vmem [thread:$0]  %s3628_s6, 64, %s63_s22, [#allocation6]  }
  0x4e   :  { %s2865_s23 = scalar_lea.hbm %s3633_s11, 3072 }
  0x4f   :  { %p2866_p4 = scmp.ne.s32.totalorder %s3633_s11, %s2865_s23  ;;  %p2869_p5 = scmp.lt.u32.totalorder %s2865_s23, %s3633_s11 }
  0x51   :  { %p2871_p6 = pnand %p2869_p5, %p2866_p4 }
  0x53   :  { %2874 = shalt.err (!%p2871_p6)
}
  0x54   :  { %s2875_s0 = scalar_lea.vmem %s90_s26, 3072  ;;  %p2880_p8 = scmp.lt.s32.totalorder %s90_s26, %s90_s26 }
  0x55   :  { %p2876_p7 = scmp.ne.s32.totalorder %s90_s26, %s2875_s0  ;;  %p2881_p9 = scmp.lt.s32.totalorder %s2875_s0, %s2875_s0 }
  0x57   :  { %p2882_p10 = por %p2881_p9, %p2880_p8 }
  0x59   :  { %p2883_p11 = pnand %p2882_p10, %p2876_p7 }
  0x5b   :  { %2886 = shalt.err (!%p2883_p11)
}
  0x5c   :  { %s3648_s6 = smov 4   ;;  %s3649_s22 = smov 64  }
  0x5d   :  { %95 = dma.hbm_to_vmem [thread:$0]  %s3633_s11, 3072, %s90_s26, [#allocation9], %s3649_s22, %s3649_s22, %s3648_s6  }
  0x5e   :  { %2909 = dma.done.wait [#allocation3], 512  }
  0x5f   :  { %2910 = vsyncadd [#allocation3], 4294966784 }
  0x60   :  { %2911 = dma.done.wait [#allocation6], 96  }
  0x61   :  { %2912 = vsyncadd [#allocation6], 4294967200 }
  0x62   :  { %2913 = dma.done.wait [#allocation9], 6144  }
  0x63   :  { %2914 = vsyncadd [#allocation9], 4294961152  ;;  %v126_v0 = vlaneseq  ;;  %v2926_v1 = vmov 0   ;;  %v122_v5 = vld [vmem:[#allocation2] sm:$0xff]  ;;  %v123_v6 = vld [vmem:[#allocation2 + $0x8] sm:$0xff]  ;;  %s3650_s21 = sld [smem:[#allocation17_spill]] }
  0x64   :  { %340 = vmatprep.subr.bf16.mxu0 %v2926_v1  ;;  %v124_v7 = vld [vmem:[#allocation2 + $0x10] sm:$0xff]  ;;  %v184_v10 = vrot.slane %v123_v6, 7  ;;  %v201_v11 = vrot.slane %v123_v6, 1  ;;  %v2675_v12 = vpack.i.bf16 %v123_v6, %v122_v5  ;;  %v183_v13 = vrot.slane %v122_v5, 7  ;;  %v125_v14 = vld [vmem:[#allocation2 + $0x18] sm:$0xff]  ;;  %v2697_v40 = vld [vmem:[%s3625_s3 + $0x40] sm:$0xff]  }
  0x65   :  { %v3099_v2 = vshrl.u32 %v126_v0, 7  ;;  %v200_v15 = vrot.slane %v122_v5, 1  ;;  %v186_v16 = vrot.slane %v125_v14, 7  ;;  %v203_v17 = vrot.slane %v125_v14, 1  ;;  %v2698_v41 = vld [vmem:[%s3625_s3] sm:$0xff]   ;;  %2292 = vmatprep.subr.bf16.mxu1 %v2697_v40  ;;  %v2699_v42 = vld [vmem:[%s3625_s3 + $0x48] sm:$0xff]  }
  0x66   :  { %2676 = vrot.lane.b32.xlu0 %v2675_v12, %s3649_s22  ;;  %v2680_v19 = vpack.i.bf16 %v125_v14, %v124_v7  ;;  %v185_v20 = vrot.slane %v124_v7, 7  ;;  %v202_v21 = vrot.slane %v124_v7, 1  ;;  %vm229_vm3 = vcmask 523264   ;;  %2293 = vmatpush3.bf16.msra.mxu1 %v2698_v41  ;;  %v2700_v44 = vld [vmem:[%s3625_s3 + $0x8] sm:$0xff]   ;;  %v2701_v45 = vld [vmem:[%s3625_s3 + $0x50] sm:$0xff]   ;;  %v2706_v12 = vld [vmem:[%s3625_s3 + $0x20] sm:$0xff]  }
  0x67   :  { %v128_v3 = vadd.s32 8, %v3099_v2  ;;  %v130_v4 = vadd.s32 24, %v3099_v2  ;;  %vm187_vm0 = vcmp.lt.s32.totalorder %v3099_v2, 1  ;;  %vm204_vm1 = vcmp.lt.s32.totalorder %v3099_v2, 7  ;;  %2294 = vmatprep.subr.bf16.mxu1 %v2699_v42  ;;  %v2702_v46 = vld [vmem:[%s3625_s3 + $0x10] sm:$0xff]   ;;  %v2708_v14 = vld [vmem:[%s3625_s3 + $0x28] sm:$0xff]  }
  0x68   :  { %v3111_v22 = vsel %vm187_vm0, %v183_v13, %v184_v10  ;;  %v207_v25 = vsel %vm204_vm1, %v200_v15, %v201_v11  ;;  %v3124_v26 = vsel %vm187_vm0, %v186_v16, %v183_v13  ;;  %v208_v27 = vsel %vm204_vm1, %v203_v17, %v200_v15  ;;  %v2707_v13 = vld [vmem:[%s3625_s3 + $0x68] sm:$0xff]   ;;  %v2709_v15 = vld [vmem:[%s3625_s3 + $0x70] sm:$0xff]   ;;  %v2717_v24 = vld [vmem:[%s3625_s3 + $0xa0] sm:$0xff]   ;;  %s2931_s19 = smov [#allocation11]  }
  0x69   :  { %v142_v8 = vand.u32 15, %v128_v3  ;;  %v156_v9 = vand.u32 15, %v130_v4  ;;  %v2685_v18 = vld [vmem:[%s3650_s21] sm:$0xff]   ;;  %v2686_v23 = vld [vmem:[%s3650_s21 + $0x8] sm:$0xff]   ;;  %v206_v28 = vsel %vm204_vm1, %v201_v11, %v202_v21  ;;  %v205_v29 = vsel %vm204_vm1, %v202_v21, %v203_v17  ;;  %v2687_v35 = vld [vmem:[%s3650_s21 + $0x10] sm:$0xff]  }
  0x6a   :  { %341 = vmatpush1.bf16.msra.mxu0 %v2685_v18  ;;  %v3135_v30 = vsel %vm187_vm0, %v185_v20, %v186_v16  ;;  %v3141_v32 = vsel %vm187_vm0, %v184_v10, %v185_v20  ;;  %2681 = vrot.lane.b32.xlu0 %v2680_v19, %s3649_s22  ;;  %v2688_v38 = vld [vmem:[%s3650_s21 + $0x18] sm:$0xff]   ;;  %v2689_v39 = vld [vmem:[%s3650_s21 + $0x20] sm:$0xff]   ;;  %v2690_v43 = vld [vmem:[%s3650_s21 + $0x28] sm:$0xff]   ;;  %v135_v53 = vand.u32 15, %v3099_v2  ;;  %v129_v54 = vadd.s32 16, %v3099_v2 }
  0x6b   :  { %vm3116_vm2 = vcmp.ne.s32.totalorder %v142_v8, 15  ;;  %342 = vmatprep.subr.bf16.mxu0 %v2926_v1  ;;  %vm3144_vm4 = vcmp.ne.s32.totalorder %v156_v9, 15  ;;  %v2691_v47 = vld [vmem:[%s3650_s21 + $0x30] sm:$0xff]   ;;  %2295 = vmatpush3.bf16.msra.mxu1 %v2700_v44  ;;  %v2692_v48 = vld [vmem:[%s3650_s21 + $0x38] sm:$0xff]   ;;  %v2693_v49 = vld [vmem:[%s3650_s21 + $0x40] sm:$0xff]   ;;  %vm2927_vm7 = vmmov 1  }
  0x6c   :  { %v210_v31 = vsel %vm3116_vm2, %v206_v28, 0.0  ;;  %v212_v36 = vsel %vm3144_vm4, %v208_v27, 0.0  ;;  %2296 = vmatprep.subr.bf16.mxu1 %v2701_v45  ;;  %v2694_v50 = vld [vmem:[%s3650_s21 + $0x48] sm:$0xff]   ;;  %v2695_v51 = vld [vmem:[%s3650_s21 + $0x50] sm:$0xff]   ;;  %v2696_v52 = vld [vmem:[%s3650_s21 + $0x58] sm:$0xff]   ;;  %vm3211_vm5 = vcmp.ne.s32.totalorder %v135_v53, 0 }
  0x6d   :  { %v235_v33 = vpack.c.bf16 %v210_v31, %v207_v25  ;;  %v237_v37 = vpack.c.bf16 %v212_v36, %v205_v29  ;;  %v149_v56 = vand.u32 15, %v129_v54  ;;  %v192_v58 = vsel %vm3211_vm5, %v3124_v26, 0.0  ;;  %v2703_v9 = vld [vmem:[%s3625_s3 + $0x58] sm:$0xff]   ;;  %v2705_v11 = vld [vmem:[%s3625_s3 + $0x60] sm:$0xff]   ;;  %v2710_v16 = vld [vmem:[%s3625_s3 + $0x30] sm:$0xff]   ;;  %s2140_s21 = sshll.u32 %s2931_s19, 4  ;;  %s2141_s21 = int_to_ptr.vmem [resolvable:$true] %s2140_s21 }
  0x6e   :  { %343 = vmatpush1.bf16.msra.mxu0 %v2686_v23  ;;  %v2704_v10 = vld [vmem:[%s3625_s3 + $0x18] sm:$0xff]   ;;  %v2713_v19 = vld [vmem:[%s3625_s3 + $0x80] sm:$0xff]   ;;  %vm3288_vm8 = vmpackc.low %vm2927_vm7, %vm3211_vm5  ;;  %vm2929_vm12 = vmmov 0   ;;  %vm767_vm13 = vcmask 1040384   ;;  %vm856_vm14 = vcmask 64512   ;;  %vm936_vm15 = vcmask 1043456   ;;  %p2892_p13 = scmp.lt.s32.totalorder %s2141_s21, %s2141_s21 }
  0x6f   :  { %344 = vmatprep.subr.bf16.mxu0 %v2926_v1  ;;  %2166 = vmatprep.mubr.msk.bf16.mxu0 %vm229_vm3, %v235_v33  ;;  %vm3218_vm6 = vcmp.ne.s32.totalorder %v149_v56, 0  ;;  %v2711_v17 = vld [vmem:[%s3625_s3 + $0x78] sm:$0xff]   ;;  %v2168_v20 = vld [vmem:[%s3624_s2] ss:$0 sm:$0xff]  ;;  %v2715_v55 = vld [vmem:[%s3625_s3 + $0x90] sm:$0xff]  }
  0x70   :  { %2297 = vmatpush3.bf16.msra.mxu1 %v2702_v46  ;;  %v194_v3 = vsel %vm3218_vm6, %v3141_v32, 0.0  ;;  %v2712_v18 = vld [vmem:[%s3625_s3 + $0x38] sm:$0xff]   ;;  %vm3305_vm9 = vmpackc.low %vm2927_vm7, %vm3218_vm6  ;;  %v2718_v61 = vld [vmem:[%s3625_s3 + $0xa8] sm:$0xff]  }
  0x71   :  { %2298 = vmatprep.subr.bf16.mxu1 %v2703_v9  ;;  %vm3312_vm10 = vmpackc.low %vm3116_vm2, %vm2927_vm7  ;;  %v2716_v9 = vld [vmem:[%s3625_s3 + $0x98] sm:$0xff]   ;;  %v771_v34 = vld [vmem:[%s3629_s7 + $0x10] sm:$0xff]  ;;  %vm932_vm2 = vcmask 31744  }
  0x72   :  { %345 = vmatpush1.bf16.msra.mxu0 %v2687_v35  ;;  %vm3338_vm11 = vmpackc.low %vm3144_vm4, %vm2927_vm7 }
  0x73   :  { %346 = vmatprep.subr.bf16.mxu0 %v2926_v1 }
  0x74   :  { %2299 = vmatpush3.bf16.msra.mxu1 %v2704_v10  ;;  %v2719_v10 = vld [vmem:[%s3625_s3 + $0xb0] sm:$0xff]  }
  0x75   :  { %2300 = vmatprep.subr.bf16.mxu1 %v2705_v11  ;;  %v2720_v11 = vld [vmem:[%s3625_s3 + $0xb8] sm:$0xff]  }
  0x76   :  { %347 = vmatpush1.bf16.msra.mxu0 %v2688_v38 }
  0x77   :  { %348 = vmatprep.subr.bf16.mxu0 %v2926_v1 }
  0x78   :  { %2301 = vmatpush3.bf16.msra.mxu1 %v2706_v12 }
  0x79   :  { %2302 = vmatprep.subr.bf16.mxu1 %v2707_v13  ;;  %v769_v13 = vld [vmem:[%s3629_s7] sm:$0xff] }
  0x7a   :  { %349 = vmatpush1.bf16.msra.mxu0 %v2689_v39 }
  0x7b   :  { %350 = vmatprep.subr.bf16.mxu0 %v2926_v1 }
  0x7c   :  { %2303 = vmatpush3.bf16.msra.mxu1 %v2708_v14  ;;  %v770_v14 = vld [vmem:[%s3629_s7 + $0x8] sm:$0xff] }
  0x7d   :  { %2304 = vmatprep.subr.bf16.mxu1 %v2709_v15  ;;  %v2928_v15 = vmov 0.0|0.0  }
  0x7e   :  { %351 = vmatpush1.bf16.msra.mxu0 %v2690_v43 }
  0x7f   :  { %352 = vmatprep.subr.bf16.mxu0 %v2926_v1 }
  0x80   :  { %2305 = vmatpush3.bf16.msra.mxu1 %v2710_v16  ;;  %v2613_v16 = vpack.c.bf16 %v770_v14, %v769_v13 }
  0x81   :  { %2306 = vmatprep.subr.bf16.mxu1 %v2711_v17  ;;  %v772_v17 = vld [vmem:[%s3629_s7 + $0x18] sm:$0xff] }
  0x82   :  { %353 = vmatpush1.bf16.msra.mxu0 %v2691_v47 }
  0x83   :  { %354 = vmatprep.subr.bf16.mxu0 %v2926_v1 }
  0x84   :  { %2307 = vmatpush3.bf16.msra.mxu1 %v2712_v18  ;;  %v2616_v18 = vpack.c.bf16 %v772_v17, %v771_v34 }
  0x85   :  { %2452 = vmatprep.subr.bf16.mxu1 %v2713_v19 }
  0x86   :  { %355 = vmatpush1.bf16.msra.mxu0 %v2692_v48 }
  0x87   :  { %356 = vmatprep.subr.bf16.mxu0 %v2926_v1 }
  0x8a   :  { %357 = vmatpush1.bf16.msra.mxu0 %v2693_v49 }
  0x8b   :  { %358 = vmatprep.subr.bf16.mxu0 %v2926_v1 }
  0x8e   :  { %359 = vmatpush1.bf16.msra.mxu0 %v2694_v50 }
  0x8f   :  { %360 = vmatprep.subr.bf16.mxu0 %v2926_v1 }
  0x92   :  { %361 = vmatpush1.bf16.msra.mxu0 %v2695_v51 }
  0x93   :  { %362 = vmatprep.subr.bf16.mxu0 %v2926_v1 }
  0x96   :  { %363 = vmatpush1.bf16.msra.mxu0 %v2696_v52 }
  0x97   :  { %2612 = vmatprep.subr.bf16.mxu0 %v2928_v15 }
  0xd8   :  { %v2677_v57 = vpop.permute.xlu0 %2676 }
  0xd9   :  { %v2679_v59 = vunpack.i.h.bf16 %v2677_v57  ;;  %v2678_v60 = vunpack.i.l.bf16 %v2677_v57 }
  0xdb   :  { %v230_v62 = vsel %vm229_vm3, %v192_v58, %v2678_v60  ;;  %v231_v63 = vsel %vm229_vm3, %v3111_v22, %v2679_v59  ;;  %v2169_v22 = vld [vmem:[%s3624_s2 + $0x1] ss:$0 sm:$0xff] }
  0xdc   :  { %v234_v0 = vpack.c.bf16 %v231_v63, %v230_v62  ;;  %v2682_v1 = vpop.permute.xlu0 %2681  ;;  %v1802_v63 = vld [vmem:[%s3637_s15 + $0x8] sm:$0xff] }
  0xdd   :  { %v2684_v4 = vunpack.i.h.bf16 %v2682_v1  ;;  %v2683_v5 = vunpack.i.l.bf16 %v2682_v1 }
  0xde   :  { %373 = vmatmul.mubr.bf16.vlgmr.msra.gmra.mrb[0].mxu0 %v234_v0 }
  0xdf   :  { %2167 = vmatprep.mubr.msk.bf16.mxu0 %vm229_vm3, %v237_v37  ;;  %v232_v6 = vsel %vm229_vm3, %v194_v3, %v2683_v5  ;;  %v233_v7 = vsel %vm229_vm3, %v3135_v30, %v2684_v4  ;;  %v2714_v4 = vld [vmem:[%s3625_s3 + $0x88] sm:$0xff]   ;;  %2614 = vmatpush3.bf16.msra.mxu0 %v2613_v16 }
  0xe0   :  { %v236_v8 = vpack.c.bf16 %v233_v7, %v232_v6  ;;  %2615 = vmatprep.subr.bf16.mxu0 %v2928_v15  ;;  %v1803_v7 = vld [vmem:[%s3637_s15 + $0x10] sm:$0xff] }
  0xe3   :  { %2617 = vmatpush3.bf16.msra.mxu0 %v2616_v18 }
  0xe4   :  { %2618 = vmatprep.subr.bf16.mxu0 %v2928_v15 }
  0xe6   :  { %381 = vmatmul.mubr.bf16.gmra.mrb[4].mxu0 %v236_v8  ;;  %v1801_v8 = vld [vmem:[%s3637_s15] sm:$0xff] }
  0xe7   :  { %v2637_v12 = vpack.c.bf16 %v1802_v63, %v1801_v8 }
 0x1b1   :  { %v374_v21 = vpop.f32.mrb[0].mxu0 }
 0x1b2   :  { %v394_v23 = vmul.f32 %v2168_v20, %v374_v21  ;;  %v376_v25 = vpop.f32.mrb[1].mxu0 }
 0x1b3   :  { %v377_v26 = vpop.f32.mrb[2].mxu0 }
 0x1b4   :  { %v403_v27 = vadd.f32 %v2169_v22, %v394_v23  ;;  %v395_v28 = vmul.f32 %v2168_v20, %v377_v26  ;;  %v379_v29 = vpop.f32.mrb[3].mxu0  ;;  %v776_v23 = vld [vmem:[%s3629_s7 + $0x38] sm:$0xff]  ;;  %v777_v26 = vld [vmem:[%s3629_s7 + $0x40] sm:$0xff] }
 0x1b5   :  { %v779_v29 = vld [vmem:[%s3629_s7 + $0x50] sm:$0xff] }
 0x1b6   :  { %v407_v30 = vmax.f32 %v403_v27, 0.0  ;;  %v404_v31 = vadd.f32 %v2169_v22, %v395_v28  ;;  %v778_v27 = vld [vmem:[%s3629_s7 + $0x48] sm:$0xff] }
 0x1b7   :  { %v2625_v28 = vpack.c.bf16 %v778_v27, %v777_v26 }
 0x1b8   :  { %v408_v32 = vmax.f32 %v404_v31, 0.0  ;;  %v411_v33 = vrot.slane %v407_v30, 7  ;;  %v423_v35 = vrot.slane %v407_v30, 1 }
 0x1b9   :  { %v382_v36 = vpop.f32.mrb[4].mxu0 }
 0x1ba   :  { %v412_v37 = vrot.slane %v408_v32, 7  ;;  %v424_v38 = vrot.slane %v408_v32, 1  ;;  %v396_v39 = vmul.f32 %v2168_v20, %v382_v36  ;;  %v384_v40 = vpop.f32.mrb[5].mxu0  ;;  %v436_v41 = vpack.c.bf16 %v408_v32, %v407_v30  ;;  %v780_v30 = vld [vmem:[%s3629_s7 + $0x58] sm:$0xff]  ;;  %v781_v32 = vld [vmem:[%s3629_s7 + $0x60] sm:$0xff]  ;;  %v783_v36 = vld [vmem:[%s3629_s7 + $0x70] sm:$0xff] }
 0x1bb   :  { %v385_v42 = vpop.f32.mrb[6].mxu0  ;;  %v2628_v31 = vpack.c.bf16 %v780_v30, %v779_v29  ;;  %v855_v40 = vld [vmem:[%s3627_s5] sm:$0xff] }
 0x1bc   :  { %v405_v43 = vadd.f32 %v2169_v22, %v396_v39  ;;  %v397_v44 = vmul.f32 %v2168_v20, %v385_v42  ;;  %v387_v45 = vpop.f32.mrb[7].mxu0  ;;  %665 = vmatprep.mubr.bf16.mxu1 %v436_v41  ;;  %v417_v46 = vsel %vm187_vm0, %v411_v33, %v412_v37  ;;  %v429_v47 = vsel %vm204_vm1, %v423_v35, %v424_v38  ;;  %v774_v20 = vld [vmem:[%s3629_s7 + $0x28] sm:$0xff] }
 0x1bd   :  { %v2930_v39 = vmov 0.0  }
 0x1be   :  { %v409_v48 = vmax.f32 %v405_v43, 0.0  ;;  %v406_v49 = vadd.f32 %v2169_v22, %v397_v44  ;;  %v775_v22 = vld [vmem:[%s3629_s7 + $0x30] sm:$0xff]  ;;  %2504 = vmatprep.mubr.msk.f32.mxu0 %vm2929_vm12, %v2930_v39 }
 0x1bf   :  { %v2622_v25 = vpack.c.bf16 %v776_v23, %v775_v22 }
 0x1c0   :  { %v413_v50 = vrot.slane %v409_v48, 7  ;;  %v425_v51 = vrot.slane %v409_v48, 1  ;;  %v410_v52 = vmax.f32 %v406_v49, 0.0 }
 0x1c2   :  { %v414_v53 = vrot.slane %v410_v52, 7  ;;  %v426_v54 = vrot.slane %v410_v52, 1  ;;  %v439_v56 = vpack.c.bf16 %v410_v52, %v409_v48  ;;  %v416_v57 = vsel %vm187_vm0, %v412_v37, %v413_v50  ;;  %v784_v37 = vld [vmem:[%s3629_s7 + $0x78] sm:$0xff] }
 0x1c3   :  { %v428_v58 = vsel %vm204_vm1, %v424_v38, %v425_v51  ;;  %v2634_v38 = vpack.c.bf16 %v784_v37, %v783_v36 }
 0x1c4   :  { %v427_v59 = vsel %vm204_vm1, %v425_v51, %v426_v54  ;;  %v430_v60 = vsel %vm204_vm1, %v426_v54, %v423_v35  ;;  %v418_v62 = vsel %vm187_vm0, %v414_v53, %v411_v33  ;;  %v415_v0 = vsel %vm187_vm0, %v413_v50, %v414_v53  ;;  %v782_v33 = vld [vmem:[%s3629_s7 + $0x68] sm:$0xff]  ;;  %v2206_v54 = vld [vmem:[#allocation5] ss:$0 sm:$0xff] }
 0x1c5   :  { %v2204_v1 = vpack.c.bf16 %v430_v60, %v427_v59  ;;  %v2195_v3 = vpack.c.bf16 %v417_v46, %v418_v62  ;;  %v2198_v5 = vpack.c.bf16 %v415_v0, %v416_v57  ;;  %v2201_v6 = vpack.c.bf16 %v428_v58, %v429_v47  ;;  %v2207_v58 = vld [vmem:[#allocation5 + $0x1] ss:$0 sm:$0xff] }
 0x1c6   :  { %v2631_v35 = vpack.c.bf16 %v782_v33, %v781_v32 }
 0x1c7   :  { %2196 = vmatmul.mubr.msk.bf16.vlgmr.msra.gmra.mrb[0].mxu1 %vm3288_vm8, %v2195_v3 }
 0x1c8   :  { %2453 = vmatpush3.bf16.msra.mxu1 %v2713_v19  ;;  %673 = vmatprep.mubr.bf16.mxu1 %v439_v56  ;;  %v773_v19 = vld [vmem:[%s3629_s7 + $0x20] sm:$0xff] }
 0x1c9   :  { %2454 = vmatprep.subr.bf16.mxu1 %v2714_v4  ;;  %v2619_v21 = vpack.c.bf16 %v774_v20, %v773_v19 }
 0x1cb   :  { %2620 = vmatpush3.bf16.msra.mxu0 %v2619_v21 }
 0x1cc   :  { %2455 = vmatpush3.bf16.msra.mxu1 %v2714_v4  ;;  %2621 = vmatprep.subr.bf16.mxu0 %v2928_v15 }
 0x1cd   :  { %2456 = vmatprep.subr.bf16.mxu1 %v2715_v55 }
 0x1cf   :  { %2199 = vmatmul.mubr.msk.bf16.gmra.mrb[4].mxu1 %vm3305_vm9, %v2198_v5  ;;  %2623 = vmatpush3.bf16.msra.mxu0 %v2622_v25 }
 0x1d0   :  { %2457 = vmatpush3.bf16.msra.mxu1 %v2715_v55  ;;  %2468 = vmatprep.mubr.msk.bf16.mxu1 %vm3312_vm10, %v2201_v6 }
 0x1d1   :  { %2458 = vmatprep.subr.bf16.mxu1 %v2716_v9  ;;  %2624 = vmatprep.subr.bf16.mxu0 %v2928_v15 }
 0x1d3   :  { %2626 = vmatpush3.bf16.msra.mxu0 %v2625_v28 }
 0x1d4   :  { %2459 = vmatpush3.bf16.msra.mxu1 %v2716_v9  ;;  %2627 = vmatprep.subr.bf16.mxu0 %v2928_v15 }
 0x1d5   :  { %2460 = vmatprep.subr.bf16.mxu1 %v2717_v24 }
 0x1d7   :  { %2629 = vmatpush3.bf16.msra.mxu0 %v2628_v31  ;;  %v931_v31 = vld [vmem:[#allocation7] sm:$0xf] }
 0x1d8   :  { %2461 = vmatpush3.bf16.msra.mxu1 %v2717_v24  ;;  %2630 = vmatprep.subr.bf16.mxu0 %v2928_v15 }
 0x1d9   :  { %2462 = vmatprep.subr.bf16.mxu1 %v2718_v61 }
 0x1db   :  { %2632 = vmatpush3.bf16.msra.mxu0 %v2631_v35 }
 0x1dc   :  { %2463 = vmatpush3.bf16.msra.mxu1 %v2718_v61  ;;  %2633 = vmatprep.subr.bf16.mxu0 %v2928_v15 }
 0x1dd   :  { %2464 = vmatprep.subr.bf16.mxu1 %v2719_v10 }
 0x1df   :  { %2635 = vmatpush3.bf16.msra.mxu0 %v2634_v38  ;;  %v1016_v38 = vld [vmem:[%s3630_s8] sm:$0xff] }
 0x1e0   :  { %2465 = vmatpush3.bf16.msra.mxu1 %v2719_v10 }
 0x1e1   :  { %2466 = vmatprep.subr.bf16.mxu1 %v2720_v11 }
 0x1e4   :  { %2467 = vmatpush3.bf16.msra.mxu1 %v2720_v11 }
 0x1e5   :  { %2507 = vmatprep.subr.mxu1 %v2930_v39 }
 0x1e7   :  { %2469 = vmatmul.mubr.msk.bf16.vlgmr.msra.gmra.mrb[8].mxu1 %vm3338_vm11, %v2204_v1 }
 0x1e8   :  { %2509 = vmatprep.mubr.msk.f32.mxu1 %vm2929_vm12, %v2930_v39  ;;  %2508 = vmatpush3.msra.mxu1 %v855_v40  ;;  %v2721_v40 = vld [vmem:[#allocation8 + $0x40] sm:$0xff]  }
 0x1e9   :  { %2512 = vmatprep.subr.mxu1 %v2930_v39  ;;  %2353 = vmatprep.subr.bf16.mxu0 %v2721_v40 }
 0x29a   :  { %v2308_v41 = vpop.f32.mrb[0].mxu1 }
 0x29b   :  { %v2309_v42 = vpop.f32.mrb[1].mxu1 }
 0x29c   :  { %v2310_v43 = vadd.f32 %v2309_v42, %v2308_v41  ;;  %v2311_v44 = vpop.f32.mrb[2].mxu1  ;;  %v2722_v41 = vld [vmem:[#allocation8] sm:$0xff]  }
 0x29d   :  { %v2312_v45 = vpop.f32.mrb[3].mxu1  ;;  %v2723_v42 = vld [vmem:[#allocation8 + $0x80] sm:$0xff]  }
 0x29e   :  { %v2313_v46 = vadd.f32 %v2312_v45, %v2311_v44  ;;  %v2725_v44 = vld [vmem:[#allocation8 + $0x8] sm:$0xff]   ;;  %v2727_v45 = vld [vmem:[#allocation8 + $0x50] sm:$0xff]  }
 0x2a2   :  { %v2314_v47 = vpop.f32.mrb[4].mxu1 }
 0x2a3   :  { %v2315_v48 = vpop.f32.mrb[5].mxu1 }
 0x2a4   :  { %v2316_v49 = vadd.f32 %v2315_v48, %v2314_v47  ;;  %v2317_v50 = vpop.f32.mrb[6].mxu1  ;;  %v2730_v47 = vld [vmem:[#allocation8 + $0x58] sm:$0xff]  }
 0x2a5   :  { %v2318_v51 = vpop.f32.mrb[7].mxu1  ;;  %v2731_v48 = vld [vmem:[#allocation8 + $0x18] sm:$0xff]  }
 0x2a6   :  { %v2319_v52 = vadd.f32 %v2318_v51, %v2317_v50  ;;  %v2734_v50 = vld [vmem:[#allocation8 + $0x20] sm:$0xff]   ;;  %v2736_v51 = vld [vmem:[#allocation8 + $0x68] sm:$0xff]  }
 0x2ba   :  { %v2470_v53 = vpop.f32.mrb[8].mxu1 }
 0x2bb   :  { %v725_v56 = vadd.f32 %v2470_v53, %v2316_v49  ;;  %v716_v57 = vpop.f32.mrb[9].mxu1  ;;  %v2733_v49 = vld [vmem:[#allocation8 + $0x60] sm:$0xff]  }
 0x2bc   :  { %v717_v59 = vadd.f32 %v2310_v43, %v716_v57  ;;  %v2471_v60 = vpop.f32.mrb[10].mxu1  ;;  %v2724_v43 = vld [vmem:[#allocation8 + $0x48] sm:$0xff]  }
 0x2bd   :  { %v738_v62 = vmul.f32 %v2206_v54, %v725_v56  ;;  %v728_v0 = vadd.f32 %v2471_v60, %v2319_v52  ;;  %v719_v1 = vpop.f32.mrb[11].mxu1  ;;  %v2737_v52 = vld [vmem:[#allocation8 + $0x28] sm:$0xff]  }
 0x2be   :  { %v736_v3 = vmul.f32 %v2206_v54, %v717_v59  ;;  %v720_v4 = vadd.f32 %v2313_v46, %v719_v1  ;;  %v2728_v46 = vld [vmem:[#allocation8 + $0x10] sm:$0xff]   ;;  %v2726_v60 = vld [vmem:[#allocation8 + $0x88] sm:$0xff]   ;;  %v2732_v1 = vld [vmem:[#allocation8 + $0x98] sm:$0xff]  }
 0x2bf   :  { %v3409_v5 = vadd.f32 %v2207_v58, %v738_v62  ;;  %v739_v6 = vmul.f32 %v2206_v54, %v728_v0  ;;  %v2729_v0 = vld [vmem:[#allocation8 + $0x90] sm:$0xff]  }
 0x2c0   :  { %v3411_v55 = vadd.f32 %v2207_v58, %v736_v3  ;;  %v737_v9 = vmul.f32 %v2206_v54, %v720_v4  ;;  %v2735_v3 = vld [vmem:[#allocation8 + $0xa0] sm:$0xff]   ;;  %v2738_v4 = vld [vmem:[#allocation8 + $0xa8] sm:$0xff]  }
 0x2c1   :  { %v3413_v24 = vadd.f32 %v2207_v58, %v739_v6  ;;  %v751_v10 = vmax.f32 %v3409_v5, 0.0  ;;  %v2739_v6 = vld [vmem:[#allocation8 + $0x70] sm:$0xff]  }
 0x2c2   :  { %v3415_v61 = vadd.f32 %v2207_v58, %v737_v9  ;;  %v749_v13 = vmax.f32 %v3411_v55, 0.0  ;;  %v2740_v9 = vld [vmem:[#allocation8 + $0x30] sm:$0xff]  }
 0x2c3   :  { %v752_v11 = vmax.f32 %v3413_v24, 0.0 }
 0x2c4   :  { %v750_v14 = vmax.f32 %v3415_v61, 0.0 }
 0x2c5   :  { %v760_v16 = vadd.f32 %v752_v11, %v751_v10 }
 0x2c6   :  { %v753_v34 = vadd.f32 %v750_v14, %v749_v13 }
 0x2c7   :  { %v761_v17 = vrot.slane %v760_v16, 4 }
 0x2c8   :  { %v754_v18 = vrot.slane %v753_v34, 4 }
 0x2c9   :  { %v762_v19 = vadd.f32 %v761_v17, %v760_v16  ;;  %v2741_v16 = vld [vmem:[#allocation8 + $0xb0] sm:$0xff]   ;;  %v2743_v17 = vld [vmem:[#allocation8 + $0x38] sm:$0xff]  }
 0x2ca   :  { %v755_v20 = vadd.f32 %v754_v18, %v753_v34  ;;  %v2742_v34 = vld [vmem:[#allocation8 + $0x78] sm:$0xff]  }
 0x2cb   :  { %v763_v21 = vrot.slane %v762_v19, 2  ;;  %v2744_v18 = vld [vmem:[#allocation8 + $0xb8] sm:$0xff]  }
 0x2cc   :  { %v756_v22 = vrot.slane %v755_v20, 2 }
 0x2cd   :  { %v764_v23 = vadd.f32 %v763_v21, %v762_v19  ;;  %v2745_v19 = vld [vmem:[#allocation10 + $0x40] sm:$0xff]   ;;  %v1092_v21 = vsub.s32 0, %v3099_v2 }
 0x2ce   :  { %v757_v25 = vadd.f32 %v756_v22, %v755_v20  ;;  %v2746_v20 = vld [vmem:[#allocation10 + $0x80] sm:$0xff]   ;;  %v1098_v22 = vsub.s32 1, %v3099_v2 }
 0x2cf   :  { %v765_v26 = vrot.slane %v764_v23, 1 }
 0x2d0   :  { %v758_v27 = vrot.slane %v757_v25, 1 }
 0x2d1   :  { %v766_v28 = vadd.f32 %v765_v26, %v764_v23 }
 0x2d2   :  { %v759_v29 = vadd.f32 %v758_v27, %v757_v25 }
 0x2d4   :  { %v768_v30 = vsel %vm767_vm13, %v759_v29, %v766_v28 }
 0x2d5   :  { %2505 = vmatmul.mubr.f32.vlgmr.msra.gmra.mrb[8].mxu0 %v768_v30 }
 0x2d6   :  { %2354 = vmatpush3.bf16.msra.mxu0 %v2722_v41  ;;  %v2748_v41 = vld [vmem:[#allocation10 + $0x48] sm:$0xff]  }
 0x2d7   :  { %2355 = vmatprep.subr.bf16.mxu0 %v2724_v43 }
 0x2da   :  { %2356 = vmatpush3.bf16.msra.mxu0 %v2725_v44 }
 0x2db   :  { %2357 = vmatprep.subr.bf16.mxu0 %v2727_v45 }
 0x2de   :  { %2358 = vmatpush3.bf16.msra.mxu0 %v2728_v46 }
 0x2df   :  { %2359 = vmatprep.subr.bf16.mxu0 %v2730_v47  ;;  %v2749_v47 = vld [vmem:[#allocation10 + $0x88] sm:$0xff]  }
 0x2e2   :  { %2360 = vmatpush3.bf16.msra.mxu0 %v2731_v48 }
 0x2e3   :  { %2361 = vmatprep.subr.bf16.mxu0 %v2733_v49 }
 0x2e6   :  { %2362 = vmatpush3.bf16.msra.mxu0 %v2734_v50 }
 0x2e7   :  { %2363 = vmatprep.subr.bf16.mxu0 %v2736_v51  ;;  %v2750_v51 = vld [vmem:[#allocation10 + $0x8] sm:$0xff]  }
 0x2ea   :  { %2364 = vmatpush3.bf16.msra.mxu0 %v2737_v52  ;;  %v2751_v52 = vld [vmem:[#allocation10 + $0x50] sm:$0xff]  }
 0x2eb   :  { %2365 = vmatprep.subr.bf16.mxu0 %v2739_v6  ;;  %v2764_v6 = vld [vmem:[#allocation10 + $0xb0] sm:$0xff]  }
 0x2ee   :  { %2366 = vmatpush3.bf16.msra.mxu0 %v2740_v9  ;;  %v2765_v9 = vld [vmem:[#allocation10 + $0x30] sm:$0xff]  }
 0x2ef   :  { %2367 = vmatprep.subr.bf16.mxu0 %v2742_v34  ;;  %v2767_v34 = vld [vmem:[#allocation10 + $0xb8] sm:$0xff]  }
 0x2f2   :  { %2368 = vmatpush3.bf16.msra.mxu0 %v2743_v17  ;;  %v2768_v17 = vld [vmem:[#allocation10 + $0x38] sm:$0xff]  }
 0x2f3   :  { %2391 = vmatprep.subr.bf16.mxu0 %v2745_v19 }
 0x3a8   :  { %v851_v32 = vpop.f32.mrb[8].mxu0 }
 0x3a9   :  { %v2506_v33 = vpop.f32.mrb[9].mxu0  ;;  %2510 = vmatmul.mubr.msk.f32.vlgmr.msra.gmra.mrb[12].mxu1 %vm856_vm14, %v851_v32 }
 0x3aa   :  { %2513 = vmatpush3.msk.msra.mxu1 %vm936_vm15, %v931_v31  ;;  %2514 = vmatprep.mubr.msk.f32.mxu1 %vm2929_vm12, %v2930_v39 }
 0x3ab   :  { %2517 = vmatprep.subr.mxu1 %v2930_v39 }
 0x47c   :  { %v926_v35 = vpop.f32.mrb[12].mxu1 }
 0x47d   :  { %v930_v36 = vmax.f32 %v926_v35, 0.0  ;;  %v2511_v37 = vpop.f32.mrb[13].mxu1 }
 0x47f   :  { %2515 = vmatmul.mubr.msk.f32.vlgmr.msra.gmra.mrb[14].mxu1 %vm932_vm2, %v930_v36 }
 0x480   :  { %2519 = vmatprep.mubr.msk.f32.mxu1 %vm2929_vm12, %v2930_v39  ;;  %2518 = vmatpush3.msra.mxu1 %v1016_v38 }
 0x481   :  { %2522 = vmatprep.subr.bf16.mxu1 %v2723_v42 }
 0x552   :  { %v1006_v53 = vpop.f32.mrb[14].mxu1 }
 0x553   :  { %v1010_v54 = vsub.f32 0.0, %v1006_v53  ;;  %v2516_v56 = vpop.f32.mrb[15].mxu1  ;;  %v2752_v53 = vld [vmem:[#allocation10 + $0x90] sm:$0xff]  }
 0x554   :  { %v2754_v56 = vld [vmem:[#allocation10 + $0x58] sm:$0xff]  }
 0x555   :  { %v1011_v57 = vmul.f32 1.442695, %v1010_v54  ;;  %v2753_v54 = vld [vmem:[#allocation10 + $0x10] sm:$0xff]  }
 0x557   :  { %2769 = vpow2.f32 %v1011_v57  ;;  %v2755_v57 = vld [vmem:[#allocation10 + $0x98] sm:$0xff]  }
 0x561   :  { %v2770_v58 = vpop.eup %2769 }
 0x562   :  { %v1013_v59 = vadd.f32 1.0, %v2770_v58  ;;  %v2756_v58 = vld [vmem:[#allocation10 + $0x18] sm:$0xff]  }
 0x564   :  { %2771 = vrcp.f32 %v1013_v59  ;;  %v2757_v59 = vld [vmem:[#allocation10 + $0x60] sm:$0xff]  }
 0x56e   :  { %v2772_v62 = vpop.eup %2771 }
 0x56f   :  { %2520 = vmatmul.mubr.msk.f32.vlgmr.msra.gmra.mrb[16].mxu1 %vm856_vm14, %v2772_v62  ;;  %v2759_v62 = vld [vmem:[#allocation10 + $0x20] sm:$0xff]  }
 0x570   :  { %2523 = vmatpush3.bf16.msra.mxu1 %v2723_v42 }
 0x571   :  { %2524 = vmatprep.subr.bf16.mxu1 %v2726_v60 }
 0x574   :  { %2525 = vmatpush3.bf16.msra.mxu1 %v2726_v60  ;;  %v2758_v60 = vld [vmem:[#allocation10 + $0xa0] sm:$0xff]  }
 0x575   :  { %2526 = vmatprep.subr.bf16.mxu1 %v2729_v0 }
 0x578   :  { %2527 = vmatpush3.bf16.msra.mxu1 %v2729_v0  ;;  %v2760_v0 = vld [vmem:[#allocation10 + $0x68] sm:$0xff]  }
 0x579   :  { %2528 = vmatprep.subr.bf16.mxu1 %v2732_v1 }
 0x57c   :  { %2529 = vmatpush3.bf16.msra.mxu1 %v2732_v1  ;;  %v2761_v1 = vld [vmem:[#allocation10 + $0xa8] sm:$0xff]  }
 0x57d   :  { %2530 = vmatprep.subr.bf16.mxu1 %v2735_v3 }
 0x580   :  { %2531 = vmatpush3.bf16.msra.mxu1 %v2735_v3  ;;  %v2762_v3 = vld [vmem:[#allocation10 + $0x28] sm:$0xff]  }
 0x581   :  { %2532 = vmatprep.subr.bf16.mxu1 %v2738_v4 }
 0x584   :  { %2533 = vmatpush3.bf16.msra.mxu1 %v2738_v4  ;;  %v2763_v4 = vld [vmem:[#allocation10 + $0x70] sm:$0xff]  }
 0x585   :  { %2534 = vmatprep.subr.bf16.mxu1 %v2741_v16 }
 0x588   :  { %2535 = vmatpush3.bf16.msra.mxu1 %v2741_v16  ;;  %v2766_v16 = vld [vmem:[#allocation10 + $0x78] sm:$0xff]  }
 0x589   :  { %2536 = vmatprep.subr.bf16.mxu1 %v2744_v18 }
 0x58c   :  { %2537 = vmatpush3.bf16.msra.mxu1 %v2744_v18 }
 0x58d   :  { %2542 = vmatprep.subr.bf16.mxu1 %v2746_v20 }
 0x642   :  { %v1086_v23 = vpop.f32.mrb[16].mxu1 }
 0x643   :  { %v1093_v25 = vrot.slane %v1086_v23, %v1092_v21  ;;  %v1099_v26 = vrot.slane %v1086_v23, %v1098_v22  ;;  %v2521_v27 = vpop.f32.mrb[17].mxu1 }
 0x645   :  { %v1094_v28 = vmul.f32 %v1093_v25, %v749_v13  ;;  %v1095_v29 = vmul.f32 %v1093_v25, %v750_v14  ;;  %v1100_v30 = vmul.f32 %v1099_v26, %v751_v10  ;;  %v1101_v31 = vmul.f32 %v1099_v26, %v752_v11  ;;  %v2747_v14 = vld [vmem:[#allocation10] sm:$0xff]  }
 0x647   :  { %v1102_v32 = vrot.slane %v1094_v28, 7  ;;  %v1103_v33 = vrot.slane %v1095_v29, 7  ;;  %v1105_v35 = vrot.slane %v1101_v31, 7  ;;  %v1114_v36 = vrot.slane %v1094_v28, 1 }
 0x648   :  { %v1115_v37 = vrot.slane %v1095_v29, 1  ;;  %v1116_v38 = vrot.slane %v1100_v30, 1  ;;  %v1117_v40 = vrot.slane %v1101_v31, 1  ;;  %v1127_v13 = vpack.c.bf16 %v1095_v29, %v1094_v28  ;;  %v2248_v28 = vld [vmem:[%s3632_s10] ss:$0 sm:$0xff] }
 0x649   :  { %v1108_v55 = vsel %vm187_vm0, %v1102_v32, %v1103_v33  ;;  %v1109_v61 = vsel %vm187_vm0, %v1105_v35, %v1102_v32  ;;  %v1104_v42 = vrot.slane %v1100_v30, 7  ;;  %v1130_v44 = vpack.c.bf16 %v1101_v31, %v1100_v30  ;;  %v2249_v32 = vld [vmem:[%s3632_s10 + $0x1] ss:$0 sm:$0xff] }
 0x64a   :  { %v1118_v5 = vsel %vm204_vm1, %v1116_v38, %v1117_v40  ;;  %v1121_v24 = vsel %vm204_vm1, %v1117_v40, %v1114_v36  ;;  %v2237_v10 = vpack.c.bf16 %v1108_v55, %v1109_v61  ;;  %v1119_v11 = vsel %vm204_vm1, %v1115_v37, %v1116_v38  ;;  %1356 = vmatprep.mubr.bf16.mxu0 %v1127_v13 }
 0x64b   :  { %v1120_v43 = vsel %vm204_vm1, %v1114_v36, %v1115_v37  ;;  %v2246_v45 = vpack.c.bf16 %v1121_v24, %v1118_v5  ;;  %v1106_v48 = vsel %vm187_vm0, %v1104_v42, %v1105_v35  ;;  %v1107_v49 = vsel %vm187_vm0, %v1103_v33, %v1104_v42 }
 0x64c   :  { %2238 = vmatmul.mubr.msk.bf16.vlgmr.msra.gmra.mrb[12].mxu0 %vm3288_vm8, %v2237_v10  ;;  %v2243_v46 = vpack.c.bf16 %v1119_v11, %v1120_v43  ;;  %v2240_v50 = vpack.c.bf16 %v1106_v48, %v1107_v49 }
 0x64d   :  { %1364 = vmatprep.mubr.bf16.mxu0 %v1130_v44  ;;  %2392 = vmatpush3.bf16.msra.mxu0 %v2747_v14 }
 0x64e   :  { %2538 = vmatprep.mubr.msk.bf16.mxu1 %vm3312_vm10, %v2243_v46  ;;  %2393 = vmatprep.subr.bf16.mxu0 %v2748_v41 }
 0x64f   :  { %2539 = vmatmul.mubr.msk.bf16.vlgmr.msra.gmra.mrb[20].mxu1 %vm3338_vm11, %v2246_v45 }
 0x650   :  { %2543 = vmatpush3.bf16.msra.mxu1 %v2746_v20 }
 0x651   :  { %2544 = vmatprep.subr.bf16.mxu1 %v2749_v47  ;;  %2394 = vmatpush3.bf16.msra.mxu0 %v2750_v51 }
 0x652   :  { %2395 = vmatprep.subr.bf16.mxu0 %v2751_v52 }
 0x654   :  { %2241 = vmatmul.mubr.msk.bf16.gmra.mrb[16].mxu0 %vm3305_vm9, %v2240_v50  ;;  %2545 = vmatpush3.bf16.msra.mxu1 %v2749_v47 }
 0x655   :  { %2546 = vmatprep.subr.bf16.mxu1 %v2752_v53  ;;  %2396 = vmatpush3.bf16.msra.mxu0 %v2753_v54 }
 0x656   :  { %2397 = vmatprep.subr.bf16.mxu0 %v2754_v56 }
 0x658   :  { %2547 = vmatpush3.bf16.msra.mxu1 %v2752_v53 }
 0x659   :  { %2548 = vmatprep.subr.bf16.mxu1 %v2755_v57  ;;  %2398 = vmatpush3.bf16.msra.mxu0 %v2756_v58 }
 0x65a   :  { %2399 = vmatprep.subr.bf16.mxu0 %v2757_v59 }
 0x65c   :  { %2549 = vmatpush3.bf16.msra.mxu1 %v2755_v57 }
 0x65d   :  { %2550 = vmatprep.subr.bf16.mxu1 %v2758_v60  ;;  %2400 = vmatpush3.bf16.msra.mxu0 %v2759_v62 }
 0x65e   :  { %2401 = vmatprep.subr.bf16.mxu0 %v2760_v0 }
 0x660   :  { %2551 = vmatpush3.bf16.msra.mxu1 %v2758_v60 }
 0x661   :  { %2552 = vmatprep.subr.bf16.mxu1 %v2761_v1  ;;  %2402 = vmatpush3.bf16.msra.mxu0 %v2762_v3 }
 0x662   :  { %2403 = vmatprep.subr.bf16.mxu0 %v2763_v4 }
 0x664   :  { %2553 = vmatpush3.bf16.msra.mxu1 %v2761_v1 }
 0x665   :  { %2554 = vmatprep.subr.bf16.mxu1 %v2764_v6  ;;  %2404 = vmatpush3.bf16.msra.mxu0 %v2765_v9 }
 0x666   :  { %2405 = vmatprep.subr.bf16.mxu0 %v2766_v16 }
 0x668   :  { %2555 = vmatpush3.bf16.msra.mxu1 %v2764_v6 }
 0x669   :  { %2556 = vmatprep.subr.bf16.mxu1 %v2767_v34  ;;  %2406 = vmatpush3.bf16.msra.mxu0 %v2768_v17 }
 0x66a   :  { %2636 = vmatprep.subr.bf16.mxu0 %v2928_v15 }
 0x66c   :  { %2557 = vmatpush3.bf16.msra.mxu1 %v2767_v34 }
 0x66d   :  { %2597 = vmatprep.subr.mxu1 %v2930_v39 }
 0x71f   :  { %v2369_v18 = vpop.f32.mrb[12].mxu0 }
 0x720   :  { %v2370_v19 = vpop.f32.mrb[13].mxu0 }
 0x721   :  { %v2371_v20 = vadd.f32 %v2370_v19, %v2369_v18  ;;  %v2372_v23 = vpop.f32.mrb[14].mxu0  ;;  %v1804_v19 = vld [vmem:[%s3637_s15 + $0x18] sm:$0xff] }
 0x722   :  { %v2540_v25 = vpop.f32.mrb[20].mxu1  ;;  %v2373_v26 = vpop.f32.mrb[15].mxu0 }
 0x723   :  { %v1407_v27 = vpop.f32.mrb[21].mxu1  ;;  %v2374_v29 = vadd.f32 %v2373_v26, %v2372_v23  ;;  %v1805_v23 = vld [vmem:[%s3637_s15 + $0x20] sm:$0xff] }
 0x724   :  { %v1408_v30 = vadd.f32 %v2371_v20, %v1407_v27  ;;  %v2541_v31 = vpop.f32.mrb[22].mxu1  ;;  %v2640_v20 = vpack.c.bf16 %v1804_v19, %v1803_v7  ;;  %v1807_v27 = vld [vmem:[%s3637_s15 + $0x30] sm:$0xff] }
 0x725   :  { %v1410_v33 = vpop.f32.mrb[23].mxu1 }
 0x726   :  { %v1427_v35 = vmul.f32 %v2248_v28, %v1408_v30  ;;  %v1411_v36 = vadd.f32 %v2374_v29, %v1410_v33  ;;  %v1809_v30 = vld [vmem:[%s3637_s15 + $0x40] sm:$0xff]  ;;  %v1811_v33 = vld [vmem:[%s3637_s15 + $0x50] sm:$0xff] }
 0x727   :  { %v2375_v37 = vpop.f32.mrb[16].mxu0 }
 0x728   :  { %v1436_v38 = vadd.f32 %v2249_v32, %v1427_v35  ;;  %v1428_v40 = vmul.f32 %v2248_v28, %v1411_v36  ;;  %v2376_v55 = vpop.f32.mrb[17].mxu0  ;;  %v1812_v35 = vld [vmem:[%s3637_s15 + $0x58] sm:$0xff] }
 0x729   :  { %v2377_v61 = vadd.f32 %v2376_v55, %v2375_v37  ;;  %v2378_v13 = vpop.f32.mrb[18].mxu0  ;;  %v2652_v36 = vpack.c.bf16 %v1812_v35, %v1811_v33  ;;  %v1813_v37 = vld [vmem:[%s3637_s15 + $0x60] sm:$0xff]  ;;  %v1815_v55 = vld [vmem:[%s3637_s15 + $0x70] sm:$0xff] }
 0x72a   :  { %v1440_v14 = vmax.f32 %v1436_v38, 0.0  ;;  %v1437_v5 = vadd.f32 %v2249_v32, %v1428_v40  ;;  %v2379_v24 = vpop.f32.mrb[19].mxu0  ;;  %v1814_v38 = vld [vmem:[%s3637_s15 + $0x68] sm:$0xff] }
 0x72b   :  { %v1416_v10 = vadd.f32 %v2540_v25, %v2377_v61  ;;  %v2380_v11 = vadd.f32 %v2379_v24, %v2378_v13  ;;  %v1806_v25 = vld [vmem:[%s3637_s15 + $0x28] sm:$0xff]  ;;  %v2655_v40 = vpack.c.bf16 %v1814_v38, %v1813_v37  ;;  %v1816_v61 = vld [vmem:[%s3637_s15 + $0x78] sm:$0xff] }
 0x72c   :  { %v1441_v41 = vmax.f32 %v1437_v5, 0.0  ;;  %v1444_v42 = vrot.slane %v1440_v14, 7  ;;  %v1456_v45 = vrot.slane %v1440_v14, 1  ;;  %v2643_v26 = vpack.c.bf16 %v1806_v25, %v1805_v23 }
 0x72d   :  { %v1429_v43 = vmul.f32 %v2248_v28, %v1416_v10  ;;  %v1419_v44 = vadd.f32 %v2541_v31, %v2380_v11  ;;  %v1810_v31 = vld [vmem:[%s3637_s15 + $0x48] sm:$0xff]  ;;  %v2658_v13 = vpack.c.bf16 %v1816_v61, %v1815_v55 }
 0x72e   :  { %v1445_v46 = vrot.slane %v1441_v41, 7  ;;  %v1457_v47 = vrot.slane %v1441_v41, 1  ;;  %v1469_v48 = vpack.c.bf16 %v1441_v41, %v1440_v14  ;;  %v1887_v14 = vld [vmem:[%s3635_s13] sm:$0xff] }
 0x72f   :  { %v1438_v49 = vadd.f32 %v2249_v32, %v1429_v43  ;;  %v1430_v50 = vmul.f32 %v2248_v28, %v1419_v44  ;;  %v1808_v28 = vld [vmem:[%s3637_s15 + $0x38] sm:$0xff]  ;;  %v2286_v44 = vld [vmem:[%s3634_s12] ss:$0 sm:$0xff] }
 0x730   :  { %v1450_v51 = vsel %vm187_vm0, %v1444_v42, %v1445_v46  ;;  %1698 = vmatprep.mubr.bf16.mxu0 %v1469_v48  ;;  %v1462_v52 = vsel %vm204_vm1, %v1456_v45, %v1457_v47  ;;  %v2646_v29 = vpack.c.bf16 %v1808_v28, %v1807_v27  ;;  %v2287_v48 = vld [vmem:[%s3634_s12 + $0x1] ss:$0 sm:$0xff] }
 0x731   :  { %v1442_v53 = vmax.f32 %v1438_v49, 0.0  ;;  %v1439_v54 = vadd.f32 %v2249_v32, %v1430_v50  ;;  %v2649_v32 = vpack.c.bf16 %v1810_v31, %v1809_v30 }
 0x733   :  { %v1446_v56 = vrot.slane %v1442_v53, 7  ;;  %v1458_v57 = vrot.slane %v1442_v53, 1  ;;  %v1443_v58 = vmax.f32 %v1439_v54, 0.0 }
 0x735   :  { %v1447_v59 = vrot.slane %v1443_v58, 7  ;;  %v1459_v60 = vrot.slane %v1443_v58, 1  ;;  %v1461_v62 = vsel %vm204_vm1, %v1457_v47, %v1458_v57  ;;  %v1472_v0 = vpack.c.bf16 %v1443_v58, %v1442_v53 }
 0x736   :  { %v2281_v1 = vpack.c.bf16 %v1461_v62, %v1462_v52  ;;  %v1449_v3 = vsel %vm187_vm0, %v1445_v46, %v1446_v56 }
 0x737   :  { %v1451_v4 = vsel %vm187_vm0, %v1447_v59, %v1444_v42  ;;  %v1460_v6 = vsel %vm204_vm1, %v1458_v57, %v1459_v60  ;;  %v1463_v9 = vsel %vm204_vm1, %v1459_v60, %v1456_v45  ;;  %v1448_v16 = vsel %vm187_vm0, %v1446_v56, %v1447_v59 }
 0x738   :  { %v2275_v34 = vpack.c.bf16 %v1450_v51, %v1451_v4  ;;  %2558 = vmatprep.mubr.msk.bf16.mxu1 %vm3312_vm10, %v2281_v1  ;;  %v2284_v17 = vpack.c.bf16 %v1463_v9, %v1460_v6  ;;  %v2278_v18 = vpack.c.bf16 %v1448_v16, %v1449_v3 }
 0x73a   :  { %2276 = vmatmul.mubr.msk.bf16.vlgmr.msra.gmra.mrb[20].mxu0 %vm3288_vm8, %v2275_v34  ;;  %2559 = vmatmul.mubr.msk.bf16.vlgmr.msra.gmra.mrb[24].mxu1 %vm3338_vm11, %v2284_v17 }
 0x73b   :  { %1706 = vmatprep.mubr.bf16.mxu0 %v1472_v0  ;;  %2599 = vmatprep.mubr.msk.f32.mxu1 %vm2929_vm12, %v2930_v39 }
 0x73c   :  { %2638 = vmatpush3.bf16.msra.mxu0 %v2637_v12  ;;  %2598 = vmatpush3.msra.mxu1 %v1887_v14 }
 0x73d   :  { %2639 = vmatprep.subr.bf16.mxu0 %v2928_v15  ;;  %2602 = vmatprep.subr.mxu1 %v2930_v39 }
 0x740   :  { %2641 = vmatpush3.bf16.msra.mxu0 %v2640_v20 }
 0x741   :  { %2642 = vmatprep.subr.bf16.mxu0 %v2928_v15 }
 0x742   :  { %2279 = vmatmul.mubr.msk.bf16.gmra.mrb[24].mxu0 %vm3305_vm9, %v2278_v18 }
 0x743   :  { %2594 = vmatprep.mubr.msk.f32.mxu0 %vm2929_vm12, %v2930_v39 }
 0x744   :  { %2644 = vmatpush3.bf16.msra.mxu0 %v2643_v26 }
 0x745   :  { %2645 = vmatprep.subr.bf16.mxu0 %v2928_v15 }
 0x748   :  { %2647 = vmatpush3.bf16.msra.mxu0 %v2646_v29 }
 0x749   :  { %2648 = vmatprep.subr.bf16.mxu0 %v2928_v15 }
 0x74c   :  { %2650 = vmatpush3.bf16.msra.mxu0 %v2649_v32  ;;  %v1962_v32 = vld [vmem:[%s3636_s14] sm:$0xf] }
 0x74d   :  { %2651 = vmatprep.subr.bf16.mxu0 %v2928_v15 }
 0x750   :  { %2653 = vmatpush3.bf16.msra.mxu0 %v2652_v36 }
 0x751   :  { %2654 = vmatprep.subr.bf16.mxu0 %v2928_v15 }
 0x754   :  { %2656 = vmatpush3.bf16.msra.mxu0 %v2655_v40  ;;  %v2045_v40 = vld [vmem:[%s3638_s16] sm:$0xff]  ;;  %s2887_s16 = scalar_lea.vmem %s2141_s21, 512 }
 0x755   :  { %2657 = vmatprep.subr.bf16.mxu0 %v2928_v15  ;;  %p2888_p12 = scmp.ne.s32.totalorder %s2141_s21, %s2887_s16  ;;  %p2893_p0 = scmp.lt.s32.totalorder %s2887_s16, %s2887_s16 }
 0x757   :  { %p2894_p1 = por %p2893_p0, %p2892_p13 }
 0x758   :  { %2659 = vmatpush3.bf16.msra.mxu0 %v2658_v13 }
 0x759   :  { %p2895_p2 = pnand %p2894_p1, %p2888_p12 }
 0x80d   :  { %v2407_v5 = vpop.f32.mrb[20].mxu0  ;;  %v2560_v24 = vpop.f32.mrb[24].mxu1 }
 0x80e   :  { %v2408_v10 = vpop.f32.mrb[21].mxu0  ;;  %v1749_v11 = vpop.f32.mrb[25].mxu1 }
 0x80f   :  { %v2409_v41 = vadd.f32 %v2408_v10, %v2407_v5  ;;  %v2410_v42 = vpop.f32.mrb[22].mxu0  ;;  %v2561_v43 = vpop.f32.mrb[26].mxu1 }
 0x810   :  { %v2411_v15 = vpop.f32.mrb[23].mxu0  ;;  %v1752_v45 = vpop.f32.mrb[27].mxu1 }
 0x811   :  { %v1750_v46 = vadd.f32 %v2409_v41, %v1749_v11  ;;  %v2412_v47 = vadd.f32 %v2411_v15, %v2410_v42 }
 0x813   :  { %v1769_v49 = vmul.f32 %v2286_v44, %v1750_v46  ;;  %v1753_v50 = vadd.f32 %v2412_v47, %v1752_v45 }
 0x815   :  { %v3581_v51 = vadd.f32 %v2287_v48, %v1769_v49  ;;  %v1770_v52 = vmul.f32 %v2286_v44, %v1753_v50  ;;  %v2413_v53 = vpop.f32.mrb[24].mxu0 }
 0x816   :  { %v2414_v54 = vpop.f32.mrb[25].mxu0 }
 0x817   :  { %v3583_v56 = vadd.f32 %v2287_v48, %v1770_v52  ;;  %v2415_v57 = vadd.f32 %v2414_v54, %v2413_v53  ;;  %v2416_v58 = vpop.f32.mrb[26].mxu0  ;;  %v1782_v60 = vmax.f32 %v3581_v51, 0.0 }
 0x818   :  { %v2417_v59 = vpop.f32.mrb[27].mxu0 }
 0x819   :  { %v1783_v62 = vmax.f32 %v3583_v56, 0.0  ;;  %v1758_v0 = vadd.f32 %v2560_v24, %v2415_v57  ;;  %v2418_v1 = vadd.f32 %v2417_v59, %v2416_v58 }
 0x81b   :  { %v1786_v3 = vadd.f32 %v1783_v62, %v1782_v60  ;;  %v1771_v4 = vmul.f32 %v2286_v44, %v1758_v0  ;;  %v1761_v6 = vadd.f32 %v2561_v43, %v2418_v1 }
 0x81d   :  { %v1787_v9 = vrot.slane %v1786_v3, 4  ;;  %v1780_v16 = vadd.f32 %v2287_v48, %v1771_v4  ;;  %v1772_v34 = vmul.f32 %v2286_v44, %v1761_v6 }
 0x81f   :  { %v1788_v17 = vadd.f32 %v1787_v9, %v1786_v3  ;;  %v1781_v18 = vadd.f32 %v2287_v48, %v1772_v34  ;;  %v1784_v8 = vmax.f32 %v1780_v16, 0.0 }
 0x821   :  { %v1785_v63 = vmax.f32 %v1781_v18, 0.0  ;;  %v1789_v12 = vrot.slane %v1788_v17, 2 }
 0x823   :  { %v1793_v7 = vadd.f32 %v1785_v63, %v1784_v8  ;;  %v1790_v20 = vadd.f32 %v1789_v12, %v1788_v17 }
 0x825   :  { %v1794_v19 = vrot.slane %v1793_v7, 4  ;;  %v1791_v26 = vrot.slane %v1790_v20, 1 }
 0x827   :  { %v1795_v23 = vadd.f32 %v1794_v19, %v1793_v7  ;;  %v1792_v29 = vadd.f32 %v1791_v26, %v1790_v20 }
 0x829   :  { %v1796_v25 = vrot.slane %v1795_v23, 2 }
 0x82b   :  { %v1797_v27 = vadd.f32 %v1796_v25, %v1795_v23 }
 0x82d   :  { %v1798_v28 = vrot.slane %v1797_v27, 1 }
 0x82f   :  { %v1799_v30 = vadd.f32 %v1798_v28, %v1797_v27 }
 0x831   :  { %v1800_v31 = vsel %vm767_vm13, %v1792_v29, %v1799_v30 }
 0x832   :  { %2595 = vmatmul.mubr.f32.vlgmr.msra.gmra.mrb[10].mxu0 %v1800_v31 }
 0x905   :  { %v1883_v33 = vpop.f32.mrb[10].mxu0 }
 0x906   :  { %v2596_v35 = vpop.f32.mrb[11].mxu0  ;;  %2600 = vmatmul.mubr.msk.f32.vlgmr.msra.gmra.mrb[18].mxu1 %vm856_vm14, %v1883_v33 }
 0x907   :  { %2603 = vmatpush3.msk.msra.mxu1 %vm936_vm15, %v1962_v32  ;;  %2604 = vmatprep.mubr.msk.f32.mxu1 %vm2929_vm12, %v2930_v39 }
 0x908   :  { %2607 = vmatprep.subr.mxu1 %v2930_v39 }
 0x9d9   :  { %v1957_v36 = vpop.f32.mrb[18].mxu1 }
 0x9da   :  { %v1961_v37 = vmax.f32 %v1957_v36, 0.0  ;;  %v2601_v38 = vpop.f32.mrb[19].mxu1 }
 0x9dc   :  { %2605 = vmatmul.mubr.msk.f32.vlgmr.msra.gmra.mrb[28].mxu1 %vm932_vm2, %v1961_v37 }
 0x9dd   :  { %2609 = vmatprep.mubr.msk.f32.mxu1 %vm2929_vm12, %v2930_v39  ;;  %2608 = vmatpush3.msra.mxu1 %v2045_v40 }
 0xaaf   :  { %v2035_v55 = vpop.f32.mrb[28].mxu1 }
 0xab0   :  { %v2039_v61 = vsub.f32 0.0, %v2035_v55  ;;  %v2606_v13 = vpop.f32.mrb[29].mxu1 }
 0xab2   :  { %v2040_v14 = vmul.f32 1.442695, %v2039_v61 }
 0xab4   :  { %2773 = vpow2.f32 %v2040_v14 }
 0xabe   :  { %v2774_v5 = vpop.eup %2773 }
 0xabf   :  { %v2042_v24 = vadd.f32 1.0, %v2774_v5 }
 0xac1   :  { %2775 = vrcp.f32 %v2042_v24 }
 0xacb   :  { %v2776_v10 = vpop.eup %2775 }
 0xacc   :  { %2610 = vmatmul.mubr.msk.f32.vlgmr.msra.gmra.mrb[30].mxu1 %vm856_vm14, %v2776_v10 }
 0xb9f   :  { %v2115_v11 = vpop.f32.mrb[30].mxu1 }
 0xba0   :  { %v2122_v39 = vrot.slane %v2115_v11, %v1092_v21  ;;  %v2128_v41 = vrot.slane %v2115_v11, %v1098_v22  ;;  %v2611_v42 = vpop.f32.mrb[31].mxu1 }
 0xba2   :  { %v2123_v43 = vmul.f32 %v2122_v39, %v1782_v60  ;;  %v2124_v44 = vmul.f32 %v2122_v39, %v1783_v62  ;;  %v2129_v15 = vmul.f32 %v2128_v41, %v1784_v8  ;;  %v2130_v45 = vmul.f32 %v2128_v41, %v1785_v63 }
 0xba4   :  { %2131 = vst [vmem:[#allocation11] sm:$0xff] %v2123_v43  ;;  %2132 = vst [vmem:[#allocation11 + $0x8] sm:$0xff] %v2124_v44 }
 0xba5   :  { %2133 = vst [vmem:[#allocation11 + $0x10] sm:$0xff] %v2129_v15  ;;  %2134 = vst [vmem:[#allocation11 + $0x18] sm:$0xff] %v2130_v45 }
 0xba6   :  { %2898 = shalt.err (!%p2895_p2)
}
 0xba7   :  { %s2899_s8 = scalar_lea.hbm %s3639_s17, 512 }
 0xba8   :  { %p2900_p3 = scmp.ne.s32.totalorder %s3639_s17, %s2899_s8  ;;  %p2903_p4 = scmp.lt.u32.totalorder %s2899_s8, %s3639_s17 }
 0xbaa   :  { %p2905_p5 = pnand %p2903_p4, %p2900_p3 }
 0xbac   :  { %2908 = shalt.err (!%p2905_p5)
}
 0xbad   :  { %2146 = dma.vmem_to_hbm [thread:$0]  %s2141_s21, 512, %s3639_s17, [#allocation4], %s2922_s9, %s2922_s9, %s2923_s27  }
 0xbae   :  { %2915 = dma.done.wait [#allocation4], 512  }
 0xbaf   :  { %2916 = vsyncadd [#allocation4], 4294966784 }
 0xbb0   :  { %2150 = vsyncpa [#allocation3], 1 }
 0xbb1   :  { %2151 = vsyncpa [#allocation6], 1 }
 0xbb2   :  { %2152 = vsyncpa [#allocation9], 1 }
 0xbb3   :  { %2153 = vsyncpa [#allocation4], 1 }

</bundles_post_ra>
